<compile_context>
chip_gen: v7x
topology: tpu7x:2x2x1
jax: 0.10.0
libtpu: 0.0.40
codegen_flags: <defaults>
</compile_context>

<pallas_src>
import functools

import jax
import jax.numpy as jnp
from jax.experimental import pallas as pl
from jax.experimental.pallas import tpu as pltpu

BIG_POSITIVE = 1000000.0
SELU_ALPHA = 1.6732632423543772848170429916717
SELU_SCALE = 1.0507009873554804934193349852946


def _selu(z):
    return SELU_SCALE * jnp.where(z > 0, z, SELU_ALPHA * (jnp.exp(z) - 1.0))


def _make_graph_gather_kernel(n_att_layers, n_emb_layers, graphs_per_block,
                              n_nodes, compute_dtype):
    """Builds the fused GraphGather kernel for a fixed layer count / tiling."""
    n_att_refs = 2 * n_att_layers
    n_emb_refs = 2 * n_emb_layers

    def kernel(*refs):
        cat_ref, h_ref, m_ref = refs[:3]
        att_refs = refs[3:3 + n_att_refs]
        emb_refs = refs[3 + n_att_refs:3 + n_att_refs + n_emb_refs]
        out_ref = refs[3 + n_att_refs + n_emb_refs]

        tb, nn = graphs_per_block, n_nodes
        rows = tb * nn

        cat2 = cat_ref[...].reshape(rows, cat_ref.shape[-1])   # bf16 [rows, H+Fn]
        h2 = h_ref[...].reshape(rows, h_ref.shape[-1])         # bf16 [rows, H]

        def mlp(x, param_refs, n_layers):
            # x is compute_dtype; each dot accumulates f32 on the MXU,
            # bias + SELU run in f32, then re-cast for the next layer.
            for li in range(n_layers):
                w = param_refs[2 * li][...]
                b = param_refs[2 * li + 1][...]
                z = jnp.dot(x, w, preferred_element_type=jnp.float32) + b
                a = _selu(z)
                x = a if li == n_layers - 1 else a.astype(compute_dtype)
            return x                                            # f32 [rows, O]

        att = mlp(cat2, att_refs, n_att_layers)
        emb = mlp(h2, emb_refs, n_emb_layers)

        out_f = att.shape[-1]
        energies = att.reshape(tb, nn, out_f) + m_ref[...]      # additive -1e6 bias
        embedding = emb.reshape(tb, nn, out_f)

        # ---- masked softmax over nodes + attention-weighted readout (f32) ----
        e_max = jnp.max(energies, axis=1, keepdims=True)        # [tb, 1, O]
        p = jnp.exp(energies - e_max)                           # unnormalized attn
        denom = jnp.sum(p, axis=1)                              # [tb, O]
        weighted = jnp.sum(p * embedding, axis=1)               # [tb, O]
        out_ref[...] = (weighted * pl.reciprocal(denom, approx=True)
                        ).astype(out_ref.dtype)

    return kernel


def _choose_graphs_per_block(batch, n_nodes, target_rows=2048, min_steps=4):
    """Largest divisor of `batch` keeping tb*n_nodes <= target_rows.

    Prefers (a) leaving >= min_steps grid steps so both v7x TensorCores get
    pipelined work, and (b) a sublane-aligned tb (multiple of 8 or == batch)
    so the (tb, O) output block stores are unmasked.
    """
    fits = [d for d in range(1, batch + 1)
            if batch % d == 0 and d * n_nodes <= target_rows]
    if not fits:
        return 1

    def prefer(cands):
        aligned = [d for d in cands if d % 8 == 0 or d == batch]
        return max(aligned) if aligned else max(cands)

    multi = [d for d in fits if batch // d >= min_steps]
    return prefer(multi) if multi else prefer(fits)


@functools.partial(jax.jit, static_argnames=("compute_dtype",))
def graph_gather_forward(hidden_nodes, input_nodes, node_mask, att_params,
                         emb_params, compute_dtype=jnp.bfloat16):
    """Fused GraphGather forward.

    hidden_nodes: [B, N, hidden_node_features] float32
    input_nodes:  [B, N, node_features]        float32
    node_mask:    [B, N]   (nonzero = real node, 0 = padding)
    att_params / emb_params: lists of (W [in_f, out_f], b [out_f]) per layer
                             (W is the transposed PyTorch Linear weight).
    """
    B, N, H = hidden_nodes.shape
    Fn = input_nodes.shape[-1]
    O = att_params[-1][0].shape[-1]

    # Pad the node dim so in-kernel (tb,N,F)<->(rows,F) reshapes are free
    # relabelings (bf16 packs 16 rows per sublane group). Padding rows get the
    # -1e6 mask bias, so they contribute exactly 0 attention weight.
    sub = 16 if compute_dtype == jnp.bfloat16 else 8
    n_pad = (-N) % sub
    if n_pad:
        hidden_nodes = jnp.pad(hidden_nodes, ((0, 0), (0, n_pad), (0, 0)))
        input_nodes = jnp.pad(input_nodes, ((0, 0), (0, n_pad), (0, 0)))
        node_mask = jnp.pad(node_mask, ((0, 0), (0, n_pad)))
    N = N + n_pad

    # Concat once in HBM (single K = H+Fn first-layer matmul in the kernel).
    cat = jnp.concatenate([hidden_nodes, input_nodes], axis=2).astype(compute_dtype)
    hidden_c = hidden_nodes.astype(compute_dtype)
    mask_bias = jnp.where(node_mask == 0, -BIG_POSITIVE, 0.0
                          ).astype(jnp.float32).reshape(B, N, 1)

    tb = _choose_graphs_per_block(B, N)
    grid = (B // tb,)

    operands = [cat, hidden_c, mask_bias]
    for w, b in att_params:
        operands += [w.astype(compute_dtype), b.reshape(1, -1).astype(jnp.float32)]
    for w, b in emb_params:
        operands += [w.astype(compute_dtype), b.reshape(1, -1).astype(jnp.float32)]

    in_specs = [
        pl.BlockSpec((tb, N, H + Fn), lambda g: (g, 0, 0)),
        pl.BlockSpec((tb, N, H), lambda g: (g, 0, 0)),
        pl.BlockSpec((tb, N, 1), lambda g: (g, 0, 0)),
    ]
    # Weights / biases: full-array blocks, resident in VMEM (tiny).
    in_specs += [pl.BlockSpec(op.shape, lambda g: (0, 0)) for op in operands[3:]]

    out = pl.pallas_call(
        _make_graph_gather_kernel(len(att_params), len(emb_params), tb, N,
                                  compute_dtype),
        out_shape=jax.ShapeDtypeStruct((B, O), jnp.float32),
        grid_spec=pltpu.PrefetchScalarGridSpec(
            num_scalar_prefetch=0,
            grid=grid,
            in_specs=in_specs,
            out_specs=pl.BlockSpec((tb, O), lambda g: (g, 0)),
        ),
        compiler_params=pltpu.CompilerParams(
            dimension_semantics=("parallel",),
        ),
    )(*operands)

    return out


def init_mlp_params(key, in_features, hidden_layer_sizes, out_features):
    """Xavier-uniform weights (init='uniform'), PyTorch-default uniform bias.

    Weights are stored as [in_f, out_f] (PyTorch weight.T) so the kernel
    computes y = x @ W + b directly on the MXU.
    """
    fs = [in_features, *hidden_layer_sizes, out_features]
    params = []
    for in_f, out_f in zip(fs, fs[1:]):
        key, wk, bk = jax.random.split(key, 3)
        limit = (6.0 / (in_f + out_f)) ** 0.5
        w = jax.random.uniform(wk, (in_f, out_f), minval=-limit, maxval=limit,
                               dtype=jnp.float32)
        b_lim = 1.0 / (in_f ** 0.5)
        b = jax.random.uniform(bk, (out_f,), minval=-b_lim, maxval=b_lim,
                               dtype=jnp.float32)
        params.append((w, b))
    return params


def init_graph_gather_params(key, node_features, hidden_node_features, out_features,
                             att_depth, att_hidden_dim, emb_depth, emb_hidden_dim):
    k_att, k_emb = jax.random.split(key)
    att_params = init_mlp_params(k_att, node_features + hidden_node_features,
                                 [att_hidden_dim] * att_depth, out_features)
    emb_params = init_mlp_params(k_emb, hidden_node_features,
                                 [emb_hidden_dim] * emb_depth, out_features)
    return att_params, emb_params


# ---------------------------- pure-JAX references ----------------------------
def _mlp_reference(x, params, compute_dtype=None):
    for w, b in params:
        if compute_dtype is not None:
            x = x.astype(compute_dtype)
            w = w.astype(compute_dtype)
        x = _selu(jnp.dot(x, w, preferred_element_type=jnp.float32) + b)
    return x


def graph_gather_reference(hidden_nodes, input_nodes, node_mask, att_params,
                           emb_params, compute_dtype=None):
    cat = jnp.concatenate([hidden_nodes, input_nodes], axis=2)
    energy_mask = (node_mask == 0).astype(jnp.float32) * BIG_POSITIVE
    energies = _mlp_reference(cat, att_params, compute_dtype) - energy_mask[..., None]
    attention = jax.nn.softmax(energies, axis=1)
    embedding = _mlp_reference(hidden_nodes, emb_params, compute_dtype)
    return jnp.sum(attention * embedding, axis=1)


if __name__ == "__main__":
    key = jax.random.PRNGKey(0)

    batch = 32                 # graphs
    n_nodes = 14               # nodes per graph (wrapper pads to 16)
    node_features = 16
    hidden_node_features = 48
    out_features = 128         # lane-dense output (multiple of 128)
    att_depth, att_hidden_dim = 2, 128
    emb_depth, emb_hidden_dim = 2, 128

    key, kh, kx, km = jax.random.split(key, 4)
    hidden_nodes = jax.random.normal(
        kh, (batch, n_nodes, hidden_node_features), dtype=jnp.float32)
    input_nodes = jax.random.normal(
        kx, (batch, n_nodes, node_features), dtype=jnp.float32)
    node_mask = (jax.random.uniform(km, (batch, n_nodes)) > 0.25).astype(jnp.float32)
    node_mask = node_mask.at[:, 0].set(1.0)   # at least one real node per graph

    att_params, emb_params = init_graph_gather_params(
        key, node_features, hidden_node_features, out_features,
        att_depth, att_hidden_dim, emb_depth, emb_hidden_dim)

    out = graph_gather_forward(hidden_nodes, input_nodes, node_mask,
                               att_params, emb_params)
    out = jax.block_until_ready(out)
    assert out.shape == (batch, out_features)

    # Tight check vs. a reference that mirrors the bf16-matmul / f32-accumulate
    # numerics of the kernel.
    ref_bf16 = graph_gather_reference(hidden_nodes, input_nodes, node_mask,
                                      att_params, emb_params,
                                      compute_dtype=jnp.bfloat16)
    assert jnp.allclose(out, ref_bf16, atol=2e-2, rtol=2e-2), \
        float(jnp.max(jnp.abs(out - ref_bf16)))

    # Loose sanity check vs. the full-f32 reference.
    ref_f32 = graph_gather_reference(hidden_nodes, input_nodes, node_mask,
                                     att_params, emb_params)
    assert jnp.allclose(out, ref_f32, atol=0.25, rtol=0.25), \
        float(jnp.max(jnp.abs(out - ref_f32)))

    print("KERNEL_OK")
</pallas_src>

<mosaic_0001>
module attributes {stable_mosaic.version = 11 : i64} {
  func.func @kernel(%arg0: i32, %arg1: memref<8x16x64xbf16, #tpu.memory_space<vmem>>, %arg2: memref<8x16x48xbf16, #tpu.memory_space<vmem>>, %arg3: memref<8x16x1xf32, #tpu.memory_space<vmem>>, %arg4: memref<64x128xbf16, #tpu.memory_space<vmem>>, %arg5: memref<1x128xf32, #tpu.memory_space<vmem>>, %arg6: memref<128x128xbf16, #tpu.memory_space<vmem>>, %arg7: memref<1x128xf32, #tpu.memory_space<vmem>>, %arg8: memref<128x128xbf16, #tpu.memory_space<vmem>>, %arg9: memref<1x128xf32, #tpu.memory_space<vmem>>, %arg10: memref<48x128xbf16, #tpu.memory_space<vmem>>, %arg11: memref<1x128xf32, #tpu.memory_space<vmem>>, %arg12: memref<128x128xbf16, #tpu.memory_space<vmem>>, %arg13: memref<1x128xf32, #tpu.memory_space<vmem>>, %arg14: memref<128x128xbf16, #tpu.memory_space<vmem>>, %arg15: memref<1x128xf32, #tpu.memory_space<vmem>>, %arg16: memref<8x128xf32, #tpu.memory_space<vmem>>) attributes {dimension_semantics = [#tpu.dimension_semantics<parallel>], iteration_bounds = array<i64: 4>, scalar_prefetch = 0 : i64, scratch_operands = 0 : i64, tpu.core_type = #tpu.core_type<tc>, window_params = [{transform_indices = @transform_0, window_bounds = array<i64: 8, 16, 64>}, {transform_indices = @transform_1, window_bounds = array<i64: 8, 16, 48>}, {transform_indices = @transform_2, window_bounds = array<i64: 8, 16, 1>}, {pipeline_mode = #tpu.pipeline_mode<synchronous>, transform_indices = @transform_3, window_bounds = array<i64: 64, 128>}, {pipeline_mode = #tpu.pipeline_mode<synchronous>, transform_indices = @transform_4, window_bounds = array<i64: 1, 128>}, {pipeline_mode = #tpu.pipeline_mode<synchronous>, transform_indices = @transform_5, window_bounds = array<i64: 128, 128>}, {pipeline_mode = #tpu.pipeline_mode<synchronous>, transform_indices = @transform_6, window_bounds = array<i64: 1, 128>}, {pipeline_mode = #tpu.pipeline_mode<synchronous>, transform_indices = @transform_7, window_bounds = array<i64: 128, 128>}, {pipeline_mode = #tpu.pipeline_mode<synchronous>, transform_indices = @transform_8, window_bounds = array<i64: 1, 128>}, {pipeline_mode = #tpu.pipeline_mode<synchronous>, transform_indices = @transform_9, window_bounds = array<i64: 48, 128>}, {pipeline_mode = #tpu.pipeline_mode<synchronous>, transform_indices = @transform_10, window_bounds = array<i64: 1, 128>}, {pipeline_mode = #tpu.pipeline_mode<synchronous>, transform_indices = @transform_11, window_bounds = array<i64: 128, 128>}, {pipeline_mode = #tpu.pipeline_mode<synchronous>, transform_indices = @transform_12, window_bounds = array<i64: 1, 128>}, {pipeline_mode = #tpu.pipeline_mode<synchronous>, transform_indices = @transform_13, window_bounds = array<i64: 128, 128>}, {pipeline_mode = #tpu.pipeline_mode<synchronous>, transform_indices = @transform_14, window_bounds = array<i64: 1, 128>}, {transform_indices = @transform_15, window_bounds = array<i64: 8, 128>}]} {
    %c0 = arith.constant 0 : index
    %c0_0 = arith.constant 0 : index
    %c0_1 = arith.constant 0 : index
    %0 = vector.load %arg1[%c0, %c0_0, %c0_1] : memref<8x16x64xbf16, #tpu.memory_space<vmem>>, vector<8x16x64xbf16>
    %1 = vector.shape_cast %0 : vector<8x16x64xbf16> to vector<128x64xbf16>
    %c0_2 = arith.constant 0 : index
    %c0_3 = arith.constant 0 : index
    %c0_4 = arith.constant 0 : index
    %2 = vector.load %arg2[%c0_2, %c0_3, %c0_4] : memref<8x16x48xbf16, #tpu.memory_space<vmem>>, vector<8x16x48xbf16>
    %3 = vector.shape_cast %2 : vector<8x16x48xbf16> to vector<128x48xbf16>
    %c0_5 = arith.constant 0 : index
    %c0_6 = arith.constant 0 : index
    %4 = vector.load %arg4[%c0_5, %c0_6] : memref<64x128xbf16, #tpu.memory_space<vmem>>, vector<64x128xbf16>
    %c0_7 = arith.constant 0 : index
    %c0_8 = arith.constant 0 : index
    %5 = vector.load %arg5[%c0_7, %c0_8] : memref<1x128xf32, #tpu.memory_space<vmem>>, vector<1x128xf32>
    %cst = arith.constant dense<0.000000e+00> : vector<128x128xf32>
    %6 = tpu.matmul %1, %4, %cst {dimension_numbers = #tpu.dot_dimension_numbers<[1], [0], [0], [1], [0, 0, 1, 1], [], []>} : vector<128x64xbf16>, vector<64x128xbf16>, vector<128x128xf32> -> vector<128x128xf32>
    %7 = vector.broadcast %5 : vector<1x128xf32> to vector<128x128xf32>
    %8 = arith.addf %6, %7 : vector<128x128xf32>
    %cst_9 = arith.constant 0.000000e+00 : f32
    %9 = vector.broadcast %cst_9 : f32 to vector<128x128xf32>
    %10 = arith.cmpf ogt, %8, %9 : vector<128x128xf32>
    %11 = math.exp %8 : vector<128x128xf32>
    %cst_10 = arith.constant 1.000000e+00 : f32
    %12 = vector.broadcast %cst_10 : f32 to vector<128x128xf32>
    %13 = arith.subf %11, %12 : vector<128x128xf32>
    %cst_11 = arith.constant 1.67326319 : f32
    %14 = vector.broadcast %cst_11 : f32 to vector<128x128xf32>
    %15 = arith.mulf %14, %13 : vector<128x128xf32>
    %16 = arith.select %10, %8, %15 : vector<128x128xi1>, vector<128x128xf32>
    %cst_12 = arith.constant 1.05070102 : f32
    %17 = vector.broadcast %cst_12 : f32 to vector<128x128xf32>
    %18 = arith.mulf %17, %16 : vector<128x128xf32>
    %19 = arith.truncf %18 : vector<128x128xf32> to vector<128x128xbf16>
    %c0_13 = arith.constant 0 : index
    %c0_14 = arith.constant 0 : index
    %20 = vector.load %arg6[%c0_13, %c0_14] : memref<128x128xbf16, #tpu.memory_space<vmem>>, vector<128x128xbf16>
    %c0_15 = arith.constant 0 : index
    %c0_16 = arith.constant 0 : index
    %21 = vector.load %arg7[%c0_15, %c0_16] : memref<1x128xf32, #tpu.memory_space<vmem>>, vector<1x128xf32>
    %cst_17 = arith.constant dense<0.000000e+00> : vector<128x128xf32>
    %22 = tpu.matmul %19, %20, %cst_17 {dimension_numbers = #tpu.dot_dimension_numbers<[1], [0], [0], [1], [0, 0, 1, 1], [], []>} : vector<128x128xbf16>, vector<128x128xbf16>, vector<128x128xf32> -> vector<128x128xf32>
    %23 = vector.broadcast %21 : vector<1x128xf32> to vector<128x128xf32>
    %24 = arith.addf %22, %23 : vector<128x128xf32>
    %cst_18 = arith.constant 0.000000e+00 : f32
    %25 = vector.broadcast %cst_18 : f32 to vector<128x128xf32>
    %26 = arith.cmpf ogt, %24, %25 : vector<128x128xf32>
    %27 = math.exp %24 : vector<128x128xf32>
    %cst_19 = arith.constant 1.000000e+00 : f32
    %28 = vector.broadcast %cst_19 : f32 to vector<128x128xf32>
    %29 = arith.subf %27, %28 : vector<128x128xf32>
    %cst_20 = arith.constant 1.67326319 : f32
    %30 = vector.broadcast %cst_20 : f32 to vector<128x128xf32>
    %31 = arith.mulf %30, %29 : vector<128x128xf32>
    %32 = arith.select %26, %24, %31 : vector<128x128xi1>, vector<128x128xf32>
    %cst_21 = arith.constant 1.05070102 : f32
    %33 = vector.broadcast %cst_21 : f32 to vector<128x128xf32>
    %34 = arith.mulf %33, %32 : vector<128x128xf32>
    %35 = arith.truncf %34 : vector<128x128xf32> to vector<128x128xbf16>
    %c0_22 = arith.constant 0 : index
    %c0_23 = arith.constant 0 : index
    %36 = vector.load %arg8[%c0_22, %c0_23] : memref<128x128xbf16, #tpu.memory_space<vmem>>, vector<128x128xbf16>
    %c0_24 = arith.constant 0 : index
    %c0_25 = arith.constant 0 : index
    %37 = vector.load %arg9[%c0_24, %c0_25] : memref<1x128xf32, #tpu.memory_space<vmem>>, vector<1x128xf32>
    %cst_26 = arith.constant dense<0.000000e+00> : vector<128x128xf32>
    %38 = tpu.matmul %35, %36, %cst_26 {dimension_numbers = #tpu.dot_dimension_numbers<[1], [0], [0], [1], [0, 0, 1, 1], [], []>} : vector<128x128xbf16>, vector<128x128xbf16>, vector<128x128xf32> -> vector<128x128xf32>
    %39 = vector.broadcast %37 : vector<1x128xf32> to vector<128x128xf32>
    %40 = arith.addf %38, %39 : vector<128x128xf32>
    %cst_27 = arith.constant 0.000000e+00 : f32
    %41 = vector.broadcast %cst_27 : f32 to vector<128x128xf32>
    %42 = arith.cmpf ogt, %40, %41 : vector<128x128xf32>
    %43 = math.exp %40 : vector<128x128xf32>
    %cst_28 = arith.constant 1.000000e+00 : f32
    %44 = vector.broadcast %cst_28 : f32 to vector<128x128xf32>
    %45 = arith.subf %43, %44 : vector<128x128xf32>
    %cst_29 = arith.constant 1.67326319 : f32
    %46 = vector.broadcast %cst_29 : f32 to vector<128x128xf32>
    %47 = arith.mulf %46, %45 : vector<128x128xf32>
    %48 = arith.select %42, %40, %47 : vector<128x128xi1>, vector<128x128xf32>
    %cst_30 = arith.constant 1.05070102 : f32
    %49 = vector.broadcast %cst_30 : f32 to vector<128x128xf32>
    %50 = arith.mulf %49, %48 : vector<128x128xf32>
    %c0_31 = arith.constant 0 : index
    %c0_32 = arith.constant 0 : index
    %51 = vector.load %arg10[%c0_31, %c0_32] : memref<48x128xbf16, #tpu.memory_space<vmem>>, vector<48x128xbf16>
    %c0_33 = arith.constant 0 : index
    %c0_34 = arith.constant 0 : index
    %52 = vector.load %arg11[%c0_33, %c0_34] : memref<1x128xf32, #tpu.memory_space<vmem>>, vector<1x128xf32>
    %cst_35 = arith.constant dense<0.000000e+00> : vector<128x128xf32>
    %53 = tpu.matmul %3, %51, %cst_35 {dimension_numbers = #tpu.dot_dimension_numbers<[1], [0], [0], [1], [0, 0, 1, 1], [], []>} : vector<128x48xbf16>, vector<48x128xbf16>, vector<128x128xf32> -> vector<128x128xf32>
    %54 = vector.broadcast %52 : vector<1x128xf32> to vector<128x128xf32>
    %55 = arith.addf %53, %54 : vector<128x128xf32>
    %cst_36 = arith.constant 0.000000e+00 : f32
    %56 = vector.broadcast %cst_36 : f32 to vector<128x128xf32>
    %57 = arith.cmpf ogt, %55, %56 : vector<128x128xf32>
    %58 = math.exp %55 : vector<128x128xf32>
    %cst_37 = arith.constant 1.000000e+00 : f32
    %59 = vector.broadcast %cst_37 : f32 to vector<128x128xf32>
    %60 = arith.subf %58, %59 : vector<128x128xf32>
    %cst_38 = arith.constant 1.67326319 : f32
    %61 = vector.broadcast %cst_38 : f32 to vector<128x128xf32>
    %62 = arith.mulf %61, %60 : vector<128x128xf32>
    %63 = arith.select %57, %55, %62 : vector<128x128xi1>, vector<128x128xf32>
    %cst_39 = arith.constant 1.05070102 : f32
    %64 = vector.broadcast %cst_39 : f32 to vector<128x128xf32>
    %65 = arith.mulf %64, %63 : vector<128x128xf32>
    %66 = arith.truncf %65 : vector<128x128xf32> to vector<128x128xbf16>
    %c0_40 = arith.constant 0 : index
    %c0_41 = arith.constant 0 : index
    %67 = vector.load %arg12[%c0_40, %c0_41] : memref<128x128xbf16, #tpu.memory_space<vmem>>, vector<128x128xbf16>
    %c0_42 = arith.constant 0 : index
    %c0_43 = arith.constant 0 : index
    %68 = vector.load %arg13[%c0_42, %c0_43] : memref<1x128xf32, #tpu.memory_space<vmem>>, vector<1x128xf32>
    %cst_44 = arith.constant dense<0.000000e+00> : vector<128x128xf32>
    %69 = tpu.matmul %66, %67, %cst_44 {dimension_numbers = #tpu.dot_dimension_numbers<[1], [0], [0], [1], [0, 0, 1, 1], [], []>} : vector<128x128xbf16>, vector<128x128xbf16>, vector<128x128xf32> -> vector<128x128xf32>
    %70 = vector.broadcast %68 : vector<1x128xf32> to vector<128x128xf32>
    %71 = arith.addf %69, %70 : vector<128x128xf32>
    %cst_45 = arith.constant 0.000000e+00 : f32
    %72 = vector.broadcast %cst_45 : f32 to vector<128x128xf32>
    %73 = arith.cmpf ogt, %71, %72 : vector<128x128xf32>
    %74 = math.exp %71 : vector<128x128xf32>
    %cst_46 = arith.constant 1.000000e+00 : f32
    %75 = vector.broadcast %cst_46 : f32 to vector<128x128xf32>
    %76 = arith.subf %74, %75 : vector<128x128xf32>
    %cst_47 = arith.constant 1.67326319 : f32
    %77 = vector.broadcast %cst_47 : f32 to vector<128x128xf32>
    %78 = arith.mulf %77, %76 : vector<128x128xf32>
    %79 = arith.select %73, %71, %78 : vector<128x128xi1>, vector<128x128xf32>
    %cst_48 = arith.constant 1.05070102 : f32
    %80 = vector.broadcast %cst_48 : f32 to vector<128x128xf32>
    %81 = arith.mulf %80, %79 : vector<128x128xf32>
    %82 = arith.truncf %81 : vector<128x128xf32> to vector<128x128xbf16>
    %c0_49 = arith.constant 0 : index
    %c0_50 = arith.constant 0 : index
    %83 = vector.load %arg14[%c0_49, %c0_50] : memref<128x128xbf16, #tpu.memory_space<vmem>>, vector<128x128xbf16>
    %c0_51 = arith.constant 0 : index
    %c0_52 = arith.constant 0 : index
    %84 = vector.load %arg15[%c0_51, %c0_52] : memref<1x128xf32, #tpu.memory_space<vmem>>, vector<1x128xf32>
    %cst_53 = arith.constant dense<0.000000e+00> : vector<128x128xf32>
    %85 = tpu.matmul %82, %83, %cst_53 {dimension_numbers = #tpu.dot_dimension_numbers<[1], [0], [0], [1], [0, 0, 1, 1], [], []>} : vector<128x128xbf16>, vector<128x128xbf16>, vector<128x128xf32> -> vector<128x128xf32>
    %86 = vector.broadcast %84 : vector<1x128xf32> to vector<128x128xf32>
    %87 = arith.addf %85, %86 : vector<128x128xf32>
    %cst_54 = arith.constant 0.000000e+00 : f32
    %88 = vector.broadcast %cst_54 : f32 to vector<128x128xf32>
    %89 = arith.cmpf ogt, %87, %88 : vector<128x128xf32>
    %90 = math.exp %87 : vector<128x128xf32>
    %cst_55 = arith.constant 1.000000e+00 : f32
    %91 = vector.broadcast %cst_55 : f32 to vector<128x128xf32>
    %92 = arith.subf %90, %91 : vector<128x128xf32>
    %cst_56 = arith.constant 1.67326319 : f32
    %93 = vector.broadcast %cst_56 : f32 to vector<128x128xf32>
    %94 = arith.mulf %93, %92 : vector<128x128xf32>
    %95 = arith.select %89, %87, %94 : vector<128x128xi1>, vector<128x128xf32>
    %cst_57 = arith.constant 1.05070102 : f32
    %96 = vector.broadcast %cst_57 : f32 to vector<128x128xf32>
    %97 = arith.mulf %96, %95 : vector<128x128xf32>
    %98 = vector.shape_cast %50 : vector<128x128xf32> to vector<8x16x128xf32>
    %c0_58 = arith.constant 0 : index
    %c0_59 = arith.constant 0 : index
    %c0_60 = arith.constant 0 : index
    %99 = vector.load %arg3[%c0_58, %c0_59, %c0_60] : memref<8x16x1xf32, #tpu.memory_space<vmem>>, vector<8x16x1xf32>
    %100 = vector.broadcast %99 : vector<8x16x1xf32> to vector<8x16x128xf32>
    %101 = arith.addf %98, %100 : vector<8x16x128xf32>
    %102 = vector.shape_cast %97 : vector<128x128xf32> to vector<8x16x128xf32>
    %cst_61 = arith.constant dense<0xFF800000> : vector<8x128xf32>
    %103 = vector.multi_reduction <maximumf>, %101, %cst_61 [1] : vector<8x16x128xf32> to vector<8x128xf32>
    %104 = vector.shape_cast %103 : vector<8x128xf32> to vector<8x1x128xf32>
    %105 = vector.broadcast %104 : vector<8x1x128xf32> to vector<8x16x128xf32>
    %106 = arith.subf %101, %105 : vector<8x16x128xf32>
    %107 = math.exp %106 : vector<8x16x128xf32>
    %cst_62 = arith.constant dense<0.000000e+00> : vector<8x128xf32>
    %108 = vector.multi_reduction <add>, %107, %cst_62 [1] : vector<8x16x128xf32> to vector<8x128xf32>
    %109 = arith.mulf %107, %102 : vector<8x16x128xf32>
    %cst_63 = arith.constant dense<0.000000e+00> : vector<8x128xf32>
    %110 = vector.multi_reduction <add>, %109, %cst_63 [1] : vector<8x16x128xf32> to vector<8x128xf32>
    %111 = tpu.reciprocal %108 {approx = true} : vector<8x128xf32> -> vector<8x128xf32>
    %112 = arith.mulf %110, %111 : vector<8x128xf32>
    %c0_64 = arith.constant 0 : index
    %c0_65 = arith.constant 0 : index
    %113 = vector.load %arg16[%c0_64, %c0_65] : memref<8x128xf32, #tpu.memory_space<vmem>>, vector<8x128xf32>
    tpu.vector_store %arg16[%c0_64, %c0_65], %112 {strides = array<i32>} : memref<8x128xf32, #tpu.memory_space<vmem>>, vector<8x128xf32>,
    return
  }
  func.func @transform_0(%arg0: i32) -> (i32, i32, i32) {
    %c0_i32 = arith.constant 0 : i32
    %c0_i32_0 = arith.constant 0 : i32
    %c0_i32_1 = arith.constant 0 : i32
    return %arg0, %c0_i32, %c0_i32_0 : i32, i32, i32
  }
  func.func @transform_1(%arg0: i32) -> (i32, i32, i32) {
    %c0_i32 = arith.constant 0 : i32
    %c0_i32_0 = arith.constant 0 : i32
    %c0_i32_1 = arith.constant 0 : i32
    return %arg0, %c0_i32, %c0_i32_0 : i32, i32, i32
  }
  func.func @transform_2(%arg0: i32) -> (i32, i32, i32) {
    %c0_i32 = arith.constant 0 : i32
    %c0_i32_0 = arith.constant 0 : i32
    %c0_i32_1 = arith.constant 0 : i32
    return %arg0, %c0_i32, %c0_i32_0 : i32, i32, i32
  }
  func.func @transform_3(%arg0: i32) -> (i32, i32) {
    %c0_i32 = arith.constant 0 : i32
    %c0_i32_0 = arith.constant 0 : i32
    %c0_i32_1 = arith.constant 0 : i32
    return %c0_i32, %c0_i32_0 : i32, i32
  }
  func.func @transform_4(%arg0: i32) -> (i32, i32) {
    %c0_i32 = arith.constant 0 : i32
    %c0_i32_0 = arith.constant 0 : i32
    %c0_i32_1 = arith.constant 0 : i32
    return %c0_i32, %c0_i32_0 : i32, i32
  }
  func.func @transform_5(%arg0: i32) -> (i32, i32) {
    %c0_i32 = arith.constant 0 : i32
    %c0_i32_0 = arith.constant 0 : i32
    %c0_i32_1 = arith.constant 0 : i32
    return %c0_i32, %c0_i32_0 : i32, i32
  }
  func.func @transform_6(%arg0: i32) -> (i32, i32) {
    %c0_i32 = arith.constant 0 : i32
    %c0_i32_0 = arith.constant 0 : i32
    %c0_i32_1 = arith.constant 0 : i32
    return %c0_i32, %c0_i32_0 : i32, i32
  }
  func.func @transform_7(%arg0: i32) -> (i32, i32) {
    %c0_i32 = arith.constant 0 : i32
    %c0_i32_0 = arith.constant 0 : i32
    %c0_i32_1 = arith.constant 0 : i32
    return %c0_i32, %c0_i32_0 : i32, i32
  }
  func.func @transform_8(%arg0: i32) -> (i32, i32) {
    %c0_i32 = arith.constant 0 : i32
    %c0_i32_0 = arith.constant 0 : i32
    %c0_i32_1 = arith.constant 0 : i32
    return %c0_i32, %c0_i32_0 : i32, i32
  }
  func.func @transform_9(%arg0: i32) -> (i32, i32) {
    %c0_i32 = arith.constant 0 : i32
    %c0_i32_0 = arith.constant 0 : i32
    %c0_i32_1 = arith.constant 0 : i32
    return %c0_i32, %c0_i32_0 : i32, i32
  }
  func.func @transform_10(%arg0: i32) -> (i32, i32) {
    %c0_i32 = arith.constant 0 : i32
    %c0_i32_0 = arith.constant 0 : i32
    %c0_i32_1 = arith.constant 0 : i32
    return %c0_i32, %c0_i32_0 : i32, i32
  }
  func.func @transform_11(%arg0: i32) -> (i32, i32) {
    %c0_i32 = arith.constant 0 : i32
    %c0_i32_0 = arith.constant 0 : i32
    %c0_i32_1 = arith.constant 0 : i32
    return %c0_i32, %c0_i32_0 : i32, i32
  }
  func.func @transform_12(%arg0: i32) -> (i32, i32) {
    %c0_i32 = arith.constant 0 : i32
    %c0_i32_0 = arith.constant 0 : i32
    %c0_i32_1 = arith.constant 0 : i32
    return %c0_i32, %c0_i32_0 : i32, i32
  }
  func.func @transform_13(%arg0: i32) -> (i32, i32) {
    %c0_i32 = arith.constant 0 : i32
    %c0_i32_0 = arith.constant 0 : i32
    %c0_i32_1 = arith.constant 0 : i32
    return %c0_i32, %c0_i32_0 : i32, i32
  }
  func.func @transform_14(%arg0: i32) -> (i32, i32) {
    %c0_i32 = arith.constant 0 : i32
    %c0_i32_0 = arith.constant 0 : i32
    %c0_i32_1 = arith.constant 0 : i32
    return %c0_i32, %c0_i32_0 : i32, i32
  }
  func.func @transform_15(%arg0: i32) -> (i32, i32) {
    %c0_i32 = arith.constant 0 : i32
    %c0_i32_0 = arith.constant 0 : i32
    return %arg0, %c0_i32 : i32, i32
  }
}

</mosaic_0001>

<bundles_post_ra>
// kernel: graph_gather_forward.1
= control target key start
LH: loop header
LB: loop body
LE: loop exit
PB: predicated region body
PF: predicated region fallthrough
CT: control target
= control target key end

     0   :  { %s4993_s0 = inlined_call_operand.vmem [shape: bf16[32,16,64], index: 0, kind: input, shape index: {}]   ;;  %s4994_s1 = inlined_call_operand.vmem [shape: bf16[32,16,48], index: 1, kind: input, shape index: {}]   ;;  %s4995_s2 = inlined_call_operand.vmem [shape: f32[32,16,1], index: 2, kind: input, shape index: {}]   ;;  %s4996_s3 = inlined_call_operand.vmem [shape: bf16[64,128], index: 3, kind: input, shape index: {}]   ;;  %s4997_s4 = inlined_call_operand.vmem [shape: f32[1,128], index: 4, kind: input, shape index: {}]   ;;  %s4998_s5 = inlined_call_operand.vmem [shape: bf16[128,128], index: 5, kind: input, shape index: {}]   ;;  %s4999_s6 = inlined_call_operand.vmem [shape: f32[1,128], index: 6, kind: input, shape index: {}]   ;;  %s5000_s7 = inlined_call_operand.vmem [shape: bf16[128,128], index: 7, kind: input, shape index: {}]   ;;  %s5001_s8 = inlined_call_operand.vmem [shape: f32[1,128], index: 8, kind: input, shape index: {}]   ;;  %s5002_s9 = inlined_call_operand.vmem [shape: bf16[48,128], index: 9, kind: input, shape index: {}]   ;;  %s5003_s10 = inlined_call_operand.vmem [shape: f32[1,128], index: 10, kind: input, shape index: {}]   ;;  %s5004_s11 = inlined_call_operand.vmem [shape: bf16[128,128], index: 11, kind: input, shape index: {}]   ;;  %s5005_s12 = inlined_call_operand.vmem [shape: f32[1,128], index: 12, kind: input, shape index: {}]   ;;  %s5006_s13 = inlined_call_operand.vmem [shape: bf16[128,128], index: 13, kind: input, shape index: {}]   ;;  %s5007_s14 = inlined_call_operand.vmem [shape: f32[1,128], index: 14, kind: input, shape index: {}]   ;;  %s5008_s15 = inlined_call_operand.hbm [shape: f32[32,128], index: 15, kind: output, shape index: {}]  }
   0x1   :  { %5012 = sst [smem:[#allocation8_spill]] %s4993_s0 }
   0x2   :  { %5013 = sst [smem:[#allocation9_spill]] %s4994_s1 }
   0x3   :  { %20 = vsyncpa [#allocation3], 0 }
   0x4   :  { %22 = vsyncpa [#allocation3 + $0x1], 0  ;;  %s3786_s18 = smov 0   ;;  %s3788_s19 = smov 0  }
   0x5   :  { %s3790_s20 = smov 0   ;;  %s3792_s21 = smov 0  }
   0x6 LB: > { %5014 = sst [smem:[#allocation5_spill]] %s3698_s20  ;;  %s3807_s22 = sadd.s32 4294967295, %s3702_s21   ;;  %s3702_s21 = sphi %s3792_s21, %s5021_s21   ;;  %s3698_s20 = sphi %s3790_s20, %s5023_s20   ;;  %s3694_s19 = sphi %s3788_s19, %s5025_s19   ;;  %s3690_s18 = sphi %s3786_s18, %s5024_s18  }
   0x7   : > { %s2832_s23 = sadd.s32 4294967294, %s3702_s21   ;;  %s3811_s24 = sadd.s32 1, %s3702_s21  }
   0x8   : > { %5015 = sst [smem:[#allocation6_spill]] %s3811_s24  ;;  %s365_s25 = sadd.s32 1, %s3698_s20 }
   0x9   : > { %s362_s26 = ssub.s32 %s3702_s21, %s3811_s24  ;;  %p375_p0 = scmp.ne.s32.totalorder %s3698_s20, %s3694_s19 }
   0xa   : > { %p363_p1 = scmp.eq.s32.totalorder %s362_s26, 0  ;;  %p376_p2 = scmp.eq.s32.totalorder %s3807_s22, 3 }
   0xb   : > { %p381_p3 = scmp.ne.s32.totalorder %s3694_s19, %s3690_s18  ;;  %p382_p4 = scmp.eq.s32.totalorder %s2832_s23, 3 }
   0xc   : > { %s3822_s27 = scalar_select %p363_p1, %s3698_s20, %s365_s25  }
   0xd   : > { %p3824_p5 = por %p376_p2, %p375_p0  ;;  %p3828_p6 = por %p382_p4, %p381_p3 }
   0xe   : > { %5016 = sst [smem:[#allocation7_spill]] %s3822_s27  ;;  %p2835_p7 = scmp.ge.s32.totalorder %s3702_s21, 1 }
   0xf   : > { %p466_p8 = scmp.lt.s32.totalorder %s3702_s21, 5 }
  0x11   : > { %p467_p9 = pnand %p2835_p7, %p466_p8 }
  0x12   : > { %v3345_v0 = vld [vmem:[%s4996_s3] sm:$0xff] (!%p467_p9)   ;;  %s2837_s17 = sshll.u32 (!%p467_p9), %s3807_s22, 3  ;;  %v3346_v1 = vld [vmem:[%s4996_s3 + $0x8] sm:$0xff] (!%p467_p9)   ;;  %v3347_v2 = vld [vmem:[%s4996_s3 + $0x10] sm:$0xff] (!%p467_p9)   ;;  %vm660_vm0 = vcmask (!%p467_p9), 523264   ;;  %s5019_s0 = sld [smem:[#allocation8_spill]] (!%p467_p9) }
  0x13   : > { %470 = sbr.rel (%p467_p9) target bundleno = 1139 (0x473), region = 80  ;;  %p528_p10 = scmp.lt.s32.totalorder (!%p467_p9), %s2837_s17, 31  ;;  %3113 = vmatprep.subr.bf16.mxu0 (!%p467_p9), %v3345_v0  ;;  %v3357_v3 = vld [vmem:[%s4998_s5] sm:$0xff] (!%p467_p9)   ;;  %v3348_v5 = vld [vmem:[%s4996_s3 + $0x18] sm:$0xff] (!%p467_p9)   ;;  %v3358_v13 = vld [vmem:[%s4998_s5 + $0x8] sm:$0xff] (!%p467_p9)  }
  0x14   : > { %3114 = vmatpush3.bf16.msra.mxu0 (!%p467_p9), %v3345_v0  ;;  %3137 = vmatprep.subr.bf16.mxu1 (!%p467_p9), %v3357_v3  ;;  %s5020_s1 = sld [smem:[#allocation9_spill]] (!%p467_p9)  ;;  %v3359_v14 = vld [vmem:[%s4998_s5 + $0x10] sm:$0xff] (!%p467_p9)   ;;  %v3360_v15 = vld [vmem:[%s4998_s5 + $0x18] sm:$0xff] (!%p467_p9)   ;;  %v3361_v16 = vld [vmem:[%s4998_s5 + $0x20] sm:$0xff] (!%p467_p9)   ;;  %s3020_s26 = sshll.u32 (!%p467_p9), %s3807_s22, 7 }
  0x15   : > { %3115 = vmatprep.subr.bf16.mxu0 (!%p467_p9), %v3346_v1  ;;  %3138 = vmatpush3.bf16.msra.mxu1 (!%p467_p9), %v3357_v3  ;;  %v3362_v17 = vld [vmem:[%s4998_s5 + $0x28] sm:$0xff] (!%p467_p9)   ;;  %v3363_v18 = vld [vmem:[%s4998_s5 + $0x30] sm:$0xff] (!%p467_p9)   ;;  %v3364_v19 = vld [vmem:[%s4998_s5 + $0x38] sm:$0xff] (!%p467_p9)   ;;  %s3705_s22 = smov (!%p467_p9), [#allocation2]  }
  0x16   : > { %3139 = vmatprep.subr.bf16.mxu1 (!%p467_p9), %v3358_v13  ;;  %v3893_v20 = vld [vmem:[%s5002_s9] sm:$0xff] (!%p467_p9)  }
  0x17   : > { %v3376_v21 = vld [vmem:[%s5000_s7] sm:$0xff] (!%p467_p9)  }
  0x18   : > { %3116 = vmatpush3.bf16.msra.mxu0 (!%p467_p9), %v3346_v1  ;;  %v3902_v22 = vld [vmem:[%s4997_s4] ss:$0 sm:$0xff] (!%p467_p9) }
  0x19   : > { %3117 = vmatprep.subr.bf16.mxu0 (!%p467_p9), %v3347_v2  ;;  %3140 = vmatpush3.bf16.msra.mxu1 (!%p467_p9), %v3358_v13 }
  0x1a   : > { %s5027_s17 = smov (!%p528_p10, %s2837_s17), 31  ;;  %3141 = vmatprep.subr.bf16.mxu1 %v3359_v14 }
  0x1b   : > { %s3023_s16 = sshll.u32 %s5027_s17, 3 }
  0x1c   : > { %s532_s25 = scalar_lea.vmem %s5019_s0, %s3023_s16  ;;  %3118 = vmatpush3.bf16.msra.mxu0 %v3347_v2  ;;  %s3861_s30 = scalar_lea.vmem %s5020_s1, %s3023_s16 }
  0x1d   : > { %v3349_v4 = vld [vmem:[%s532_s25] sm:$0xff]   ;;  %3119 = vmatprep.subr.bf16.mxu0 %v3348_v5  ;;  %v3350_v6 = vld [vmem:[%s532_s25 + $0x8] sm:$0xff]   ;;  %v3351_v7 = vld [vmem:[%s532_s25 + $0x10] sm:$0xff]   ;;  %3142 = vmatpush3.bf16.msra.mxu1 %v3359_v14  ;;  %s3025_s0 = sshll.u32 %s5027_s17, 4  ;;  %s524_s17 = sand.u32 1, %s3694_s19  }
  0x1e   : > { %3121 = vmatprep.mubr.msk.bf16.mxu0 %vm660_vm0, %v3349_v4  ;;  %v3352_v8 = vld [vmem:[%s532_s25 + $0x18] sm:$0xff]   ;;  %v3353_v9 = vld [vmem:[%s532_s25 + $0x20] sm:$0xff]   ;;  %v3354_v10 = vld [vmem:[%s532_s25 + $0x28] sm:$0xff]   ;;  %3143 = vmatprep.subr.bf16.mxu1 %v3360_v15  ;;  %s4064_s16 = scalar_lea.vmem %s4995_s2, %s3025_s0  ;;  %s2836_s27 = sshll.u32 %s524_s17, 3 }
  0x1f   : > { %v3355_v11 = vld [vmem:[%s532_s25 + $0x30] sm:$0xff]   ;;  %v3356_v12 = vld [vmem:[%s532_s25 + $0x38] sm:$0xff]   ;;  %s526_s20 = scalar_lea.vmem [#allocation2], %s2836_s27  ;;  %s4951_s25 = scalar_lea.hbm %s5008_s15, %s3020_s26 }
  0x20   : > { %3120 = vmatpush3.bf16.msra.mxu0 %v3348_v5  ;;  %s2749_s24 = sshll.u32 %s526_s20, 4  ;;  %s2736_s23 = scalar_lea.sflag [#allocation3], %s524_s17  ;;  %s4953_s24 = int_to_ptr.vmem [resolvable:$true] %s2749_s24 }
  0x21   : > { %3144 = vmatpush3.bf16.msra.mxu1 %v3360_v15  ;;  %3169 = vmatprep.subr.bf16.mxu0 %v3376_v21  ;;  %s3644_s27 = sshll.u32 %s3705_s22, 4  ;;  %s3645_s27 = int_to_ptr.vmem [resolvable:$false] %s3644_s27 }
  0x22   : > { %3145 = vmatprep.subr.bf16.mxu1 %v3361_v16  ;;  %s3646_s1 = scalar_lea.vmem %s3645_s27, 256  ;;  %p3647_p0 = scmp.lt.s32.totalorder %s4953_s24, %s3645_s27 }
  0x23   : > { %3122 = vmatmul.mubr.msk.bf16.vlgmr.msra.gmra.mrb[0].mxu0 %vm660_vm0, %v3350_v6 }
  0x24   : > { %3125 = vmatprep.mubr.msk.bf16.mxu0 %vm660_vm0, %v3351_v7  ;;  %3170 = vmatpush3.bf16.msra.mxu0 %v3376_v21 }
  0x25   : > { %3146 = vmatpush3.bf16.msra.mxu1 %v3361_v16 }
  0x26   : > { %3147 = vmatprep.subr.bf16.mxu1 %v3362_v17 }
  0x29   : > { %3148 = vmatpush3.bf16.msra.mxu1 %v3362_v17 }
  0x2a   : > { %3149 = vmatprep.subr.bf16.mxu1 %v3363_v18 }
  0x2b   : > { %3126 = vmatmul.mubr.msk.bf16.gmra.mrb[4].mxu0 %vm660_vm0, %v3352_v8 }
  0x2c   : > { %3129 = vmatprep.mubr.msk.bf16.mxu0 %vm660_vm0, %v3353_v9 }
  0x2d   : > { %3150 = vmatpush3.bf16.msra.mxu1 %v3363_v18 }
  0x2e   : > { %3151 = vmatprep.subr.bf16.mxu1 %v3364_v19 }
  0x31   : > { %3152 = vmatpush3.bf16.msra.mxu1 %v3364_v19 }
  0x32   : > { %3201 = vmatprep.subr.bf16.mxu1 %v3893_v20 }
  0x33   : > { %3130 = vmatmul.mubr.msk.bf16.gmra.mrb[8].mxu0 %vm660_vm0, %v3354_v10 }
  0x34   : > { %3133 = vmatprep.mubr.msk.bf16.mxu0 %vm660_vm0, %v3355_v11 }
  0x3b   : > { %3134 = vmatmul.mubr.msk.bf16.gmra.mrb[12].mxu0 %vm660_vm0, %v3356_v12 }
  0xf6   : > { %v3123_v23 = vpop.f32.mrb[0].mxu0 }
  0xf7   : > { %v728_v24 = vadd.f32 %v3123_v23, %v3902_v22  ;;  %v719_v25 = vpop.f32.mrb[1].mxu0 }
  0xf8   : > { %v3906_v26 = vadd.f32 %v3902_v22, %v719_v25  ;;  %v3124_v27 = vpop.f32.mrb[2].mxu0 }
  0xf9   : > { %v802_v28 = vmul.f32 1.442695, %v728_v24  ;;  %v731_v29 = vadd.f32 %v3124_v27, %v3902_v22  ;;  %v722_v30 = vpop.f32.mrb[3].mxu0  ;;  %vm784_vm1 = vcmp.gt.f32.partialorder %v728_v24, 0.0 }
  0xfa   : > { %v798_v31 = vmul.f32 1.442695, %v3906_v26  ;;  %v3911_v32 = vadd.f32 %v3902_v22, %v722_v30  ;;  %vm782_vm3 = vcmp.gt.f32.partialorder %v3906_v26, 0.0 }
  0xfb   : > { %3400 = vpow2.f32 %v802_v28  ;;  %v804_v33 = vmul.f32 1.442695, %v731_v29  ;;  %vm785_vm2 = vcmp.gt.f32.partialorder %v731_v29, 0.0 }
  0xfc   : > { %3402 = vpow2.f32 %v798_v31  ;;  %v800_v34 = vmul.f32 1.442695, %v3911_v32  ;;  %vm783_vm5 = vcmp.gt.f32.partialorder %v3911_v32, 0.0 }
  0xfd   : > { %3404 = vpow2.f32 %v804_v33 }
  0xfe   : > { %3406 = vpow2.f32 %v800_v34  ;;  %v3127_v35 = vpop.f32.mrb[4].mxu0 }
  0xff   : > { %v3915_v36 = vadd.f32 %v3127_v35, %v3902_v22  ;;  %v735_v37 = vpop.f32.mrb[5].mxu0 }
 0x100   : > { %v3918_v38 = vadd.f32 %v3902_v22, %v735_v37  ;;  %v3128_v39 = vpop.f32.mrb[6].mxu0 }
 0x101   : > { %v810_v40 = vmul.f32 1.442695, %v3915_v36  ;;  %v3922_v41 = vadd.f32 %v3128_v39, %v3902_v22  ;;  %v738_v42 = vpop.f32.mrb[7].mxu0  ;;  %vm788_vm4 = vcmp.gt.f32.partialorder %v3915_v36, 0.0 }
 0x102   : > { %v806_v43 = vmul.f32 1.442695, %v3918_v38  ;;  %v3926_v44 = vadd.f32 %v3902_v22, %v738_v42  ;;  %vm786_vm6 = vcmp.gt.f32.partialorder %v3918_v38, 0.0 }
 0x103   : > { %3408 = vpow2.f32 %v810_v40  ;;  %v812_v45 = vmul.f32 1.442695, %v3922_v41  ;;  %vm789_vm7 = vcmp.gt.f32.partialorder %v3922_v41, 0.0 }
 0x104   : > { %3410 = vpow2.f32 %v806_v43  ;;  %v808_v46 = vmul.f32 1.442695, %v3926_v44  ;;  %vm787_vm8 = vcmp.gt.f32.partialorder %v3926_v44, 0.0 }
 0x105   : > { %v3401_v47 = vpop.eup %3400  ;;  %3412 = vpow2.f32 %v812_v45 }
 0x106   : > { %v3403_v48 = vpop.eup %3402  ;;  %v2869_v49 = vadd.f32 -1.0, %v3401_v47  ;;  %3414 = vpow2.f32 %v808_v46  ;;  %v3131_v50 = vpop.f32.mrb[8].mxu0 }
 0x107   : > { %v3405_v51 = vpop.eup %3404  ;;  %v3931_v52 = vadd.f32 %v3131_v50, %v3902_v22  ;;  %v751_v53 = vpop.f32.mrb[9].mxu0  ;;  %v2867_v59 = vadd.f32 -1.0, %v3403_v48 }
 0x108   : > { %v3407_v54 = vpop.eup %3406  ;;  %v848_v55 = vmul.f32 1.6732632, %v2869_v49  ;;  %v2870_v56 = vadd.f32 -1.0, %v3405_v51  ;;  %v3934_v57 = vadd.f32 %v3902_v22, %v751_v53  ;;  %v3132_v58 = vpop.f32.mrb[10].mxu0 }
 0x109   : > { %v818_v60 = vmul.f32 1.442695, %v3931_v52  ;;  %v3938_v61 = vadd.f32 %v3132_v58, %v3902_v22  ;;  %v754_v62 = vpop.f32.mrb[11].mxu0  ;;  %v2868_v2 = vadd.f32 -1.0, %v3407_v54  ;;  %v846_v6 = vmul.f32 1.6732632, %v2867_v59 }
 0x10a   : > { %v864_v63 = vsel %vm784_vm1, %v728_v24, %v848_v55  ;;  %v849_v0 = vmul.f32 1.6732632, %v2870_v56  ;;  %v814_v1 = vmul.f32 1.442695, %v3934_v57  ;;  %v3946_v5 = vadd.f32 %v3902_v22, %v754_v62 }
 0x10b   : > { %3416 = vpow2.f32 %v818_v60  ;;  %v820_v3 = vmul.f32 1.442695, %v3938_v61  ;;  %v3948_v8 = vmul.f32 1.050701, %v864_v63  ;;  %v847_v13 = vmul.f32 1.6732632, %v2868_v2 }
 0x10c   : > { %v865_v4 = vsel %vm785_vm2, %v731_v29, %v849_v0  ;;  %3418 = vpow2.f32 %v814_v1  ;;  %v816_v11 = vmul.f32 1.442695, %v3946_v5  ;;  %v862_v19 = vsel %vm782_vm3, %v3906_v26, %v846_v6  ;;  %v3367_v6 = vld [vmem:[%s5002_s9 + $0x10] sm:$0xff]  }
 0x10d   : > { %v3409_v7 = vpop.eup %3408  ;;  %3420 = vpow2.f32 %v820_v3  ;;  %v881_v15 = vmul.f32 1.050701, %v865_v4  ;;  %v863_v35 = vsel %vm783_vm5, %v3911_v32, %v847_v13  ;;  %v878_v40 = vmul.f32 1.050701, %v862_v19 }
 0x10e   : > { %v3411_v9 = vpop.eup %3410  ;;  %v2873_v10 = vadd.f32 -1.0, %v3409_v7  ;;  %v3135_v12 = vpop.f32.mrb[12].mxu0  ;;  %3422 = vpow2.f32 %v816_v11  ;;  %v879_v48 = vmul.f32 1.050701, %v863_v35  ;;  %vm792_vm9 = vcmp.gt.f32.partialorder %v3931_v52, 0.0 }
 0x10f   : > { %v3413_v14 = vpop.eup %3412  ;;  %v2871_v16 = vadd.f32 -1.0, %v3411_v9  ;;  %v3954_v17 = vadd.f32 %v3135_v12, %v3902_v22  ;;  %v767_v18 = vpop.f32.mrb[13].mxu0  ;;  %vm793_vm10 = vcmp.gt.f32.partialorder %v3938_v61, 0.0  ;;  %vm790_vm11 = vcmp.gt.f32.partialorder %v3934_v57, 0.0 }
 0x110   : > { %v3415_v21 = vpop.eup %3414  ;;  %v852_v23 = vmul.f32 1.6732632, %v2873_v10  ;;  %v2874_v24 = vadd.f32 -1.0, %v3413_v14  ;;  %v3960_v25 = vadd.f32 %v3902_v22, %v767_v18  ;;  %v3136_v27 = vpop.f32.mrb[14].mxu0  ;;  %v894_v56 = vpack.c.bf16 %v879_v48, %v878_v40  ;;  %v3370_v40 = vld [vmem:[%s3861_s30 + $0x10] sm:$0xff]   ;;  %v3379_v48 = vld [vmem:[%s5000_s7 + $0x18] sm:$0xff]  }
 0x111   : > { %v850_v28 = vmul.f32 1.6732632, %v2871_v16  ;;  %v2872_v29 = vadd.f32 -1.0, %v3415_v21  ;;  %v826_v30 = vmul.f32 1.442695, %v3954_v17  ;;  %v770_v34 = vpop.f32.mrb[15].mxu0  ;;  %v3980_v43 = vadd.f32 %v3136_v27, %v3902_v22 }
 0x112   : > { %v868_v31 = vsel %vm788_vm4, %v3915_v36, %v852_v23  ;;  %v853_v33 = vmul.f32 1.6732632, %v2874_v24  ;;  %v822_v26 = vmul.f32 1.442695, %v3960_v25  ;;  %v3986_v47 = vadd.f32 %v3902_v22, %v770_v34  ;;  %3153 = vmatprep.mubr.bf16.mxu1 %v894_v56  ;;  %v2352_v56 = vld [vmem:[%s4064_s16 + $0x8] sm:$0xff] }
 0x113   : > { %v3971_v37 = vmul.f32 1.050701, %v868_v31  ;;  %v851_v39 = vmul.f32 1.6732632, %v2872_v29  ;;  %3424 = vpow2.f32 %v826_v30  ;;  %v866_v42 = vsel %vm786_vm6, %v3918_v38, %v850_v28 }
 0x114   : > { %v869_v36 = vsel %vm789_vm7, %v3922_v41, %v853_v33  ;;  %3426 = vpow2.f32 %v822_v26  ;;  %v828_v41 = vmul.f32 1.442695, %v3980_v43  ;;  %v882_v53 = vmul.f32 1.050701, %v866_v42  ;;  %v3371_v42 = vld [vmem:[%s3861_s30 + $0x18] sm:$0xff]  }
 0x115   : > { %v3417_v45 = vpop.eup %3416  ;;  %v885_v46 = vmul.f32 1.050701, %v869_v36  ;;  %v867_v32 = vsel %vm787_vm8, %v3926_v44, %v851_v39  ;;  %v824_v55 = vmul.f32 1.442695, %v3986_v47  ;;  %v895_v22 = vpack.c.bf16 %v881_v15, %v3948_v8  ;;  %v3366_v44 = vld [vmem:[%s5002_s9 + $0x8] sm:$0xff]   ;;  %v3372_v36 = vld [vmem:[%s3861_s30 + $0x20] sm:$0xff]  }
 0x116   : > { %v3419_v49 = vpop.eup %3418  ;;  %v883_v38 = vmul.f32 1.050701, %v867_v32  ;;  %v2877_v50 = vadd.f32 -1.0, %v3417_v45  ;;  %3428 = vpow2.f32 %v828_v41  ;;  %vm791_vm12 = vcmp.gt.f32.partialorder %v3946_v5, 0.0  ;;  %v3369_v39 = vld [vmem:[%s3861_s30 + $0x8] sm:$0xff]   ;;  %v3374_v45 = vld [vmem:[%s3861_s30 + $0x30] sm:$0xff]  }
 0x117   : > { %v3421_v51 = vpop.eup %3420  ;;  %v2875_v54 = vadd.f32 -1.0, %v3419_v49  ;;  %3430 = vpow2.f32 %v824_v55  ;;  %v897_v63 = vpack.c.bf16 %v885_v46, %v3971_v37  ;;  %3154 = vmatmul.mubr.bf16.vlgmr.msra.gmra.mrb[0].mxu1 %v895_v22  ;;  %vm796_vm13 = vcmp.gt.f32.partialorder %v3954_v17, 0.0  ;;  %v3368_v37 = vld [vmem:[%s3861_s30] sm:$0xff]   ;;  %v3375_v46 = vld [vmem:[%s3861_s30 + $0x38] sm:$0xff]   ;;  %v3377_v32 = vld [vmem:[%s5000_s7 + $0x8] sm:$0xff]  }
 0x118   : > { %v856_v58 = vmul.f32 1.6732632, %v2877_v50  ;;  %v2878_v59 = vadd.f32 -1.0, %v3421_v51  ;;  %v896_v62 = vpack.c.bf16 %v883_v38, %v882_v53  ;;  %v3423_v0 = vpop.eup %3422  ;;  %3202 = vmatpush3.bf16.msra.mxu1 %v3893_v20  ;;  %vm794_vm14 = vcmp.gt.f32.partialorder %v3960_v25, 0.0  ;;  %3171 = vmatprep.subr.bf16.mxu0 %v3377_v32  ;;  %v3380_v49 = vld [vmem:[%s5000_s7 + $0x20] sm:$0xff]   ;;  %v3381_v38 = vld [vmem:[%s5000_s7 + $0x28] sm:$0xff]  }
 0x119   : > { %v854_v60 = vmul.f32 1.6732632, %v2875_v54  ;;  %v2876_v3 = vadd.f32 -1.0, %v3423_v0  ;;  %3203 = vmatprep.subr.bf16.mxu1 %v3366_v44  ;;  %vm797_vm15 = vcmp.gt.f32.partialorder %v3980_v43, 0.0  ;;  %vm795_vm0 = vcmp.gt.f32.partialorder %v3986_v47, 0.0  ;;  %3172 = vmatpush3.bf16.msra.mxu0 %v3377_v32  ;;  %v3382_v50 = vld [vmem:[%s5000_s7 + $0x30] sm:$0xff]  }
 0x11a   : > { %v872_v1 = vsel %vm792_vm9, %v3931_v52, %v856_v58  ;;  %v857_v2 = vmul.f32 1.6732632, %v2878_v59  ;;  %3157 = vmatprep.mubr.bf16.mxu1 %v896_v62  ;;  %vm1541_vm1 = vcmask 392192   ;;  %v3383_v41 = vld [vmem:[%s5000_s7 + $0x38] sm:$0xff]   ;;  %v4057_v51 = vld [vmem:[%s5004_s11] sm:$0xff]   ;;  %v3704_v53 = vmov 0  }
 0x11b   : > { %v888_v8 = vmul.f32 1.050701, %v872_v1  ;;  %v870_v52 = vsel %vm790_vm11, %v3934_v57, %v854_v60  ;;  %v855_v10 = vmul.f32 1.6732632, %v2876_v3  ;;  %3343 = vset.pattern.permute.xlu0 %v3704_v53  ;;  %3344 = vset.pattern.permute.xlu1 %v3704_v53  ;;  %v2351_v54 = vld [vmem:[%s4064_s16] sm:$0xff]  ;;  %v2353_v55 = vld [vmem:[%s4064_s16 + $0x10] sm:$0xff] }
 0x11c   : > { %v873_v4 = vsel %vm793_vm10, %v3938_v61, %v857_v2  ;;  %3204 = vmatpush3.bf16.msra.mxu1 %v3366_v44  ;;  %v886_v14 = vmul.f32 1.050701, %v870_v52  ;;  %2369 = vperm.xlu0 %3343, %v2351_v54   ;;  %v2354_v58 = vld [vmem:[%s4064_s16 + $0x18] sm:$0xff]  ;;  %v2355_v59 = vld [vmem:[%s4064_s16 + $0x20] sm:$0xff]  ;;  %v2356_v22 = vld [vmem:[%s4064_s16 + $0x28] sm:$0xff] }
 0x11d   : > { %v3425_v7 = vpop.eup %3424  ;;  %v889_v9 = vmul.f32 1.050701, %v873_v4  ;;  %v871_v12 = vsel %vm791_vm12, %v3946_v5, %v855_v10  ;;  %3205 = vmatprep.subr.bf16.mxu1 %v3367_v6  ;;  %2379 = vperm.xlu1 %3344, %v2353_v55   ;;  %v2357_v44 = vld [vmem:[%s4064_s16 + $0x30] sm:$0xff]  ;;  %v2358_v60 = vld [vmem:[%s4064_s16 + $0x38] sm:$0xff]  ;;  %v2359_v62 = vld [vmem:[%s4064_s16 + $0x40] sm:$0xff] }
 0x11e   : > { %v3427_v11 = vpop.eup %3426  ;;  %v2881_v20 = vadd.f32 -1.0, %v3425_v7  ;;  %v887_v15 = vmul.f32 1.050701, %v871_v12  ;;  %v2361_v0 = vld [vmem:[%s4064_s16 + $0x50] sm:$0xff]  ;;  %v2362_v1 = vld [vmem:[%s4064_s16 + $0x58] sm:$0xff]  ;;  %v2363_v2 = vld [vmem:[%s4064_s16 + $0x60] sm:$0xff] }
 0x11f   : > { %v2879_v13 = vadd.f32 -1.0, %v3427_v11  ;;  %v899_v61 = vpack.c.bf16 %v889_v9, %v888_v8  ;;  %3158 = vmatmul.mubr.bf16.gmra.mrb[4].mxu1 %v897_v63  ;;  %v2360_v63 = vld [vmem:[%s4064_s16 + $0x48] sm:$0xff]  ;;  %v2365_v4 = vld [vmem:[%s4064_s16 + $0x70] sm:$0xff]  ;;  %v4085_v7 = vld [vmem:[%s4999_s6] ss:$0 sm:$0xff] }
 0x120   : > { %v860_v16 = vmul.f32 1.6732632, %v2881_v20  ;;  %v3429_v18 = vpop.eup %3428  ;;  %v898_v21 = vpack.c.bf16 %v887_v15, %v886_v14  ;;  %3206 = vmatpush3.bf16.msra.mxu1 %v3367_v6  ;;  %2374 = vperm.xlu0 %3343, %v2352_v56   ;;  %v2364_v3 = vld [vmem:[%s4064_s16 + $0x68] sm:$0xff]  ;;  %v2366_v6 = vld [vmem:[%s4064_s16 + $0x78] sm:$0xff]  ;;  %s3640_s16 = scalar_lea.vmem %s4953_s24, 128 }
 0x121   : > { %v858_v19 = vmul.f32 1.6732632, %v2879_v13  ;;  %v3431_v57 = vpop.eup %3430  ;;  %v2882_v23 = vadd.f32 -1.0, %v3429_v18  ;;  %2384 = vperm.xlu1 %3344, %v2354_v58   ;;  %p3641_p11 = scmp.ne.s32.totalorder %s4953_s24, %s3640_s16  ;;  %p3648_p1 = scmp.lt.s32.totalorder %s3646_s1, %s3640_s16 }
 0x122   : > { %v2880_v24 = vadd.f32 -1.0, %v3431_v57  ;;  %3161 = vmatprep.mubr.bf16.mxu1 %v898_v21  ;;  %v876_v5 = vsel %vm796_vm13, %v3954_v17, %v860_v16 }
 0x123   : > { %v861_v27 = vmul.f32 1.6732632, %v2882_v23  ;;  %v874_v28 = vsel %vm794_vm14, %v3960_v25, %v858_v19  ;;  %v892_v31 = vmul.f32 1.050701, %v876_v5  ;;  %p3642_p12 = pnand %p3641_p11, %p3824_p5  ;;  %p3649_p2 = por %p3648_p1, %p3647_p0 }
 0x124   : > { %v859_v29 = vmul.f32 1.6732632, %v2880_v24  ;;  %v890_v26 = vmul.f32 1.050701, %v874_v28  ;;  %2389 = vperm.xlu0 %3343, %v2355_v59  }
 0x125   : > { %v877_v30 = vsel %vm797_vm15, %v3980_v43, %v861_v27  ;;  %v3373_v43 = vld [vmem:[%s3861_s30 + $0x28] sm:$0xff]   ;;  %2394 = vperm.xlu1 %3344, %v2356_v22   ;;  %p3643_p13 = pneg %p3642_p12 }
 0x126   : > { %v893_v33 = vmul.f32 1.050701, %v877_v30  ;;  %v875_v17 = vsel %vm795_vm0, %v3986_v47, %v859_v29  ;;  %v3378_v47 = vld [vmem:[%s5000_s7 + $0x10] sm:$0xff]  }
 0x127   : > { %v891_v34 = vmul.f32 1.050701, %v875_v17  ;;  %3162 = vmatmul.mubr.bf16.gmra.mrb[8].mxu1 %v899_v61  ;;  %3173 = vmatprep.subr.bf16.mxu0 %v3378_v47  ;;  %p3650_p3 = pnand %p3649_p2, %p3643_p13 }
 0x128   : > { %v901_v25 = vpack.c.bf16 %v893_v33, %v892_v31  ;;  %3174 = vmatpush3.bf16.msra.mxu0 %v3378_v47  ;;  %2399 = vperm.xlu0 %3343, %v2357_v44  }
 0x129   : > { %v900_v35 = vpack.c.bf16 %v891_v34, %v890_v26  ;;  %3175 = vmatprep.subr.bf16.mxu0 %v3379_v48  ;;  %2404 = vperm.xlu1 %3344, %v2358_v60  }
 0x12b   : > { %3165 = vmatprep.mubr.bf16.mxu1 %v900_v35 }
 0x12c   : > { %3176 = vmatpush3.bf16.msra.mxu0 %v3379_v48  ;;  %2409 = vperm.xlu0 %3343, %v2359_v62  }
 0x12d   : > { %3177 = vmatprep.subr.bf16.mxu0 %v3380_v49  ;;  %2414 = vperm.xlu1 %3344, %v2360_v63  }
 0x12f   : > { %3166 = vmatmul.mubr.bf16.gmra.mrb[12].mxu1 %v901_v25 }
 0x130   : > { %3207 = vmatprep.mubr.msk.bf16.mxu1 %vm1541_vm1, %v3368_v37  ;;  %3178 = vmatpush3.bf16.msra.mxu0 %v3380_v49 }
 0x131   : > { %3179 = vmatprep.subr.bf16.mxu0 %v3381_v38  ;;  %2419 = vperm.xlu0 %3343, %v2361_v0  }
 0x132   : > { %2424 = vperm.xlu1 %3344, %v2362_v1  }
 0x134   : > { %3180 = vmatpush3.bf16.msra.mxu0 %v3381_v38 }
 0x135   : > { %3181 = vmatprep.subr.bf16.mxu0 %v3382_v50  ;;  %2429 = vperm.xlu0 %3343, %v2363_v2  }
 0x136   : > { %2434 = vperm.xlu1 %3344, %v2364_v3  }
 0x137   : > { %3208 = vmatmul.mubr.msk.bf16.vlgmr.msra.gmra.mrb[16].mxu1 %vm1541_vm1, %v3369_v39 }
 0x138   : > { %3211 = vmatprep.mubr.msk.bf16.mxu1 %vm1541_vm1, %v3370_v40  ;;  %3182 = vmatpush3.bf16.msra.mxu0 %v3382_v50 }
 0x139   : > { %3183 = vmatprep.subr.bf16.mxu0 %v3383_v41  ;;  %2439 = vperm.xlu0 %3343, %v2365_v4  }
 0x13a   : > { %2444 = vperm.xlu1 %3344, %v2366_v6  }
 0x13c   : > { %3184 = vmatpush3.bf16.msra.mxu0 %v3383_v41 }
 0x13d   : > { %3223 = vmatprep.subr.bf16.mxu0 %v4057_v51 }
 0x13f   : > { %3212 = vmatmul.mubr.msk.bf16.gmra.mrb[20].mxu1 %vm1541_vm1, %v3371_v42 }
 0x140   : > { %3215 = vmatprep.mubr.msk.bf16.mxu1 %vm1541_vm1, %v3372_v36 }
 0x147   : > { %3216 = vmatmul.mubr.msk.bf16.gmra.mrb[24].mxu1 %vm1541_vm1, %v3373_v43 }
 0x148   : > { %3219 = vmatprep.mubr.msk.bf16.mxu1 %vm1541_vm1, %v3374_v45 }
 0x14f   : > { %3220 = vmatmul.mubr.msk.bf16.gmra.mrb[28].mxu1 %vm1541_vm1, %v3375_v46 }
 0x1ea   : > { %v3155_v8 = vpop.f32.mrb[0].mxu1 }
 0x1eb   : > { %v1016_v52 = vadd.f32 %v3155_v8, %v4085_v7  ;;  %v1007_v9 = vpop.f32.mrb[1].mxu1 }
 0x1ec   : > { %v4089_v10 = vadd.f32 %v4085_v7, %v1007_v9  ;;  %v3156_v11 = vpop.f32.mrb[2].mxu1 }
 0x1ed   : > { %v1090_v20 = vmul.f32 1.442695, %v1016_v52  ;;  %v1019_v12 = vadd.f32 %v3156_v11, %v4085_v7  ;;  %v1010_v13 = vpop.f32.mrb[3].mxu1  ;;  %vm1072_vm2 = vcmp.gt.f32.partialorder %v1016_v52, 0.0 }
 0x1ee   : > { %v1086_v61 = vmul.f32 1.442695, %v4089_v10  ;;  %v4094_v14 = vadd.f32 %v4085_v7, %v1010_v13  ;;  %vm1070_vm4 = vcmp.gt.f32.partialorder %v4089_v10, 0.0 }
 0x1ef   : > { %3432 = vpow2.f32 %v1090_v20  ;;  %v1092_v15 = vmul.f32 1.442695, %v1019_v12  ;;  %vm1073_vm3 = vcmp.gt.f32.partialorder %v1019_v12, 0.0 }
 0x1f0   : > { %3434 = vpow2.f32 %v1086_v61  ;;  %v1088_v16 = vmul.f32 1.442695, %v4094_v14  ;;  %vm1071_vm5 = vcmp.gt.f32.partialorder %v4094_v14, 0.0 }
 0x1f1   : > { %3436 = vpow2.f32 %v1092_v15 }
 0x1f2   : > { %3438 = vpow2.f32 %v1088_v16  ;;  %v3159_v18 = vpop.f32.mrb[4].mxu1 }
 0x1f3   : > { %v4098_v19 = vadd.f32 %v3159_v18, %v4085_v7  ;;  %v1023_v21 = vpop.f32.mrb[5].mxu1 }
 0x1f4   : > { %v4101_v57 = vadd.f32 %v4085_v7, %v1023_v21  ;;  %v3160_v23 = vpop.f32.mrb[6].mxu1 }
 0x1f5   : > { %v1098_v24 = vmul.f32 1.442695, %v4098_v19  ;;  %v4105_v5 = vadd.f32 %v3160_v23, %v4085_v7  ;;  %v1026_v27 = vpop.f32.mrb[7].mxu1  ;;  %vm1076_vm7 = vcmp.gt.f32.partialorder %v4098_v19, 0.0 }
 0x1f6   : > { %v1094_v28 = vmul.f32 1.442695, %v4101_v57  ;;  %v4109_v29 = vadd.f32 %v4085_v7, %v1026_v27  ;;  %vm1074_vm6 = vcmp.gt.f32.partialorder %v4101_v57, 0.0 }
 0x1f7   : > { %3440 = vpow2.f32 %v1098_v24  ;;  %v1100_v30 = vmul.f32 1.442695, %v4105_v5  ;;  %vm1077_vm9 = vcmp.gt.f32.partialorder %v4105_v5, 0.0 }
 0x1f8   : > { %3442 = vpow2.f32 %v1094_v28  ;;  %v1096_v31 = vmul.f32 1.442695, %v4109_v29  ;;  %vm1075_vm8 = vcmp.gt.f32.partialorder %v4109_v29, 0.0 }
 0x1f9   : > { %v3433_v33 = vpop.eup %3432  ;;  %3444 = vpow2.f32 %v1100_v30 }
 0x1fa   : > { %v3435_v17 = vpop.eup %3434  ;;  %v2894_v26 = vadd.f32 -1.0, %v3433_v33  ;;  %3446 = vpow2.f32 %v1096_v31  ;;  %v3163_v34 = vpop.f32.mrb[8].mxu1  ;;  %v4161_v33 = vld [vmem:[%s5003_s10] ss:$0 sm:$0xff] }
 0x1fb   : > { %v3437_v25 = vpop.eup %3436  ;;  %v2892_v35 = vadd.f32 -1.0, %v3435_v17  ;;  %v4114_v37 = vadd.f32 %v3163_v34, %v4085_v7  ;;  %v1039_v39 = vpop.f32.mrb[9].mxu1 }
 0x1fc   : > { %v3439_v40 = vpop.eup %3438  ;;  %v1136_v42 = vmul.f32 1.6732632, %v2894_v26  ;;  %v2895_v36 = vadd.f32 -1.0, %v3437_v25  ;;  %v4117_v43 = vadd.f32 %v4085_v7, %v1039_v39  ;;  %v3164_v45 = vpop.f32.mrb[10].mxu1 }
 0x1fd   : > { %v1134_v46 = vmul.f32 1.6732632, %v2892_v35  ;;  %v2893_v32 = vadd.f32 -1.0, %v3439_v40  ;;  %v1106_v47 = vmul.f32 1.442695, %v4114_v37  ;;  %v1042_v50 = vpop.f32.mrb[11].mxu1  ;;  %v4122_v54 = vadd.f32 %v3164_v45, %v4085_v7 }
 0x1fe   : > { %v1152_v48 = vsel %vm1072_vm2, %v1016_v52, %v1136_v42  ;;  %v1137_v49 = vmul.f32 1.6732632, %v2895_v36  ;;  %v1102_v38 = vmul.f32 1.442695, %v4117_v43  ;;  %v4128_v59 = vadd.f32 %v4085_v7, %v1042_v50 }
 0x1ff   : > { %v1135_v41 = vmul.f32 1.6732632, %v2893_v32  ;;  %3448 = vpow2.f32 %v1106_v47  ;;  %v4124_v56 = vmul.f32 1.050701, %v1152_v48  ;;  %v1150_v44 = vsel %vm1070_vm4, %v4089_v10, %v1134_v46 }
 0x200   : > { %v1153_v53 = vsel %vm1073_vm3, %v1019_v12, %v1137_v49  ;;  %3450 = vpow2.f32 %v1102_v38  ;;  %v1108_v60 = vmul.f32 1.442695, %v4122_v54  ;;  %v1104_v2 = vmul.f32 1.442695, %v4128_v59 }
 0x201   : > { %v3441_v55 = vpop.eup %3440  ;;  %v1169_v58 = vmul.f32 1.050701, %v1153_v53  ;;  %v1151_v0 = vsel %vm1071_vm5, %v4094_v14, %v1135_v41  ;;  %v1166_v15 = vmul.f32 1.050701, %v1150_v44  ;;  %vm1080_vm10 = vcmp.gt.f32.partialorder %v4114_v37, 0.0 }
 0x202   : > { %v3443_v22 = vpop.eup %3442  ;;  %v3167_v3 = vpop.f32.mrb[12].mxu1  ;;  %v2898_v6 = vadd.f32 -1.0, %v3441_v55  ;;  %3452 = vpow2.f32 %v1108_v60  ;;  %v1167_v13 = vmul.f32 1.050701, %v1151_v0  ;;  %vm1078_vm11 = vcmp.gt.f32.partialorder %v4117_v43, 0.0 }
 0x203   : > { %v3445_v62 = vpop.eup %3444  ;;  %v1183_v63 = vpack.c.bf16 %v1169_v58, %v4124_v56  ;;  %v2896_v1 = vadd.f32 -1.0, %v3443_v22  ;;  %v4139_v52 = vadd.f32 %v3167_v3, %v4085_v7  ;;  %v1055_v9 = vpop.f32.mrb[13].mxu1  ;;  %3454 = vpow2.f32 %v1104_v2  ;;  %v3386_v56 = vld [vmem:[%s5004_s11 + $0x10] sm:$0xff]  }
 0x204   : > { %v3447_v4 = vpop.eup %3446  ;;  %v2899_v8 = vadd.f32 -1.0, %v3445_v62  ;;  %v4142_v20 = vadd.f32 %v4085_v7, %v1055_v9  ;;  %v3168_v12 = vpop.f32.mrb[14].mxu1  ;;  %v1140_v21 = vmul.f32 1.6732632, %v2898_v6  ;;  %v1182_v26 = vpack.c.bf16 %v1167_v13, %v1166_v15 }
 0x205   : > { %v1138_v10 = vmul.f32 1.6732632, %v2896_v1  ;;  %v2897_v11 = vadd.f32 -1.0, %v3447_v4  ;;  %v1114_v61 = vmul.f32 1.442695, %v4139_v52  ;;  %v1058_v14 = vpop.f32.mrb[15].mxu1  ;;  %v4153_v30 = vadd.f32 %v3168_v12, %v4085_v7 }
 0x206   : > { %v1141_v16 = vmul.f32 1.6732632, %v2899_v8  ;;  %v1110_v24 = vmul.f32 1.442695, %v4142_v20  ;;  %v4156_v31 = vadd.f32 %v4085_v7, %v1058_v14  ;;  %v1156_v42 = vsel %vm1076_vm7, %v4098_v19, %v1140_v21  ;;  %3185 = vmatprep.mubr.bf16.mxu0 %v1182_v26  ;;  %v3387_v8 = vld [vmem:[%s5004_s11 + $0x18] sm:$0xff]  }
 0x207   : > { %v1139_v18 = vmul.f32 1.6732632, %v2897_v11  ;;  %v1154_v23 = vsel %vm1074_vm6, %v4101_v57, %v1138_v10  ;;  %3456 = vpow2.f32 %v1114_v61  ;;  %v1116_v39 = vmul.f32 1.442695, %v4153_v30  ;;  %3186 = vmatmul.mubr.bf16.vlgmr.msra.gmra.mrb[16].mxu0 %v1183_v63 }
 0x208   : > { %3458 = vpow2.f32 %v1110_v24  ;;  %v1170_v25 = vmul.f32 1.050701, %v1154_v23  ;;  %v1157_v7 = vsel %vm1077_vm9, %v4105_v5, %v1141_v16  ;;  %v1112_v36 = vmul.f32 1.442695, %v4156_v31  ;;  %3224 = vmatpush3.bf16.msra.mxu0 %v4057_v51  ;;  %v3388_v24 = vld [vmem:[%s5004_s11 + $0x20] sm:$0xff]  }
 0x209   : > { %v3449_v27 = vpop.eup %3448  ;;  %v1155_v28 = vsel %vm1075_vm8, %v4109_v29, %v1139_v18  ;;  %v3385_v29 = vld [vmem:[%s5004_s11 + $0x8] sm:$0xff]   ;;  %3460 = vpow2.f32 %v1116_v39  ;;  %v1173_v19 = vmul.f32 1.050701, %v1157_v7  ;;  %vm1081_vm12 = vcmp.gt.f32.partialorder %v4122_v54, 0.0 }
 0x20a   : > { %v3451_v57 = vpop.eup %3450  ;;  %v1171_v17 = vmul.f32 1.050701, %v1155_v28  ;;  %v3209_v34 = vpop.f32.mrb[16].mxu1  ;;  %v2902_v35 = vadd.f32 -1.0, %v3449_v27  ;;  %3462 = vpow2.f32 %v1112_v36  ;;  %vm1079_vm13 = vcmp.gt.f32.partialorder %v4128_v59, 0.0  ;;  %3225 = vmatprep.subr.bf16.mxu0 %v3385_v29 }
 0x20b   : > { %v1600_v40 = vpop.f32.mrb[17].mxu1  ;;  %v4174_v45 = vadd.f32 %v3209_v34, %v4161_v33  ;;  %v2900_v47 = vadd.f32 -1.0, %v3451_v57  ;;  %v1172_v58 = vmul.f32 1.050701, %v1156_v42  ;;  %vm1084_vm14 = vcmp.gt.f32.partialorder %v4139_v52, 0.0 }
 0x20c   : > { %v4177_v46 = vadd.f32 %v4161_v33, %v1600_v40  ;;  %v3210_v32 = vpop.f32.mrb[18].mxu1  ;;  %v1184_v49 = vpack.c.bf16 %v1171_v17, %v1170_v25  ;;  %v3453_v38 = vpop.eup %3452  ;;  %v1144_v53 = vmul.f32 1.6732632, %v2902_v35  ;;  %3226 = vmatpush3.bf16.msra.mxu0 %v3385_v29  ;;  %vm1082_vm15 = vcmp.gt.f32.partialorder %v4142_v20, 0.0 }
 0x20d   : > { %v4180_v5 = vadd.f32 %v3210_v32, %v4161_v33  ;;  %v1603_v48 = vpop.f32.mrb[19].mxu1  ;;  %v1683_v50 = vmul.f32 1.442695, %v4174_v45  ;;  %v3455_v41 = vpop.eup %3454  ;;  %v2903_v55 = vadd.f32 -1.0, %v3453_v38  ;;  %v1142_v44 = vmul.f32 1.6732632, %v2900_v47  ;;  %3227 = vmatprep.subr.bf16.mxu0 %v3386_v56 }
 0x20e   : > { %3189 = vmatprep.mubr.bf16.mxu0 %v1184_v49  ;;  %v2901_v22 = vadd.f32 -1.0, %v3455_v41  ;;  %v1679_v51 = vmul.f32 1.442695, %v4177_v46  ;;  %v4193_v63 = vadd.f32 %v4161_v33, %v1603_v48  ;;  %v1185_v2 = vpack.c.bf16 %v1173_v19, %v1172_v58  ;;  %v3389_v38 = vld [vmem:[%s5004_s11 + $0x28] sm:$0xff]  }
 0x20f   : > { %3464 = vpow2.f32 %v1683_v50  ;;  %v1145_v60 = vmul.f32 1.6732632, %v2903_v55  ;;  %v1685_v62 = vmul.f32 1.442695, %v4180_v5  ;;  %v1160_v4 = vsel %vm1080_vm10, %v4114_v37, %v1144_v53 }
 0x210   : > { %v1143_v1 = vmul.f32 1.6732632, %v2901_v22  ;;  %3466 = vpow2.f32 %v1679_v51  ;;  %vm1085_vm0 = vcmp.gt.f32.partialorder %v4153_v30, 0.0  ;;  %v1681_v37 = vmul.f32 1.442695, %v4193_v63  ;;  %3190 = vmatmul.mubr.bf16.gmra.mrb[20].mxu0 %v1185_v2 }
 0x211   : > { %v3457_v0 = vpop.eup %3456  ;;  %3468 = vpow2.f32 %v1685_v62  ;;  %v1161_v11 = vsel %vm1081_vm12, %v4122_v54, %v1145_v60  ;;  %v1158_v14 = vsel %vm1078_vm11, %v4117_v43, %v1142_v44  ;;  %3228 = vmatpush3.bf16.msra.mxu0 %v3386_v56  ;;  %vm1083_vm1 = vcmp.gt.f32.partialorder %v4156_v31, 0.0 }
 0x212   : > { %v3213_v3 = vpop.f32.mrb[20].mxu1  ;;  %v2906_v6 = vadd.f32 -1.0, %v3457_v0  ;;  %v3459_v10 = vpop.eup %3458  ;;  %v1159_v12 = vsel %vm1079_vm13, %v4128_v59, %v1143_v1  ;;  %3470 = vpow2.f32 %v1681_v37  ;;  %v1177_v27 = vmul.f32 1.050701, %v1161_v11  ;;  %3229 = vmatprep.subr.bf16.mxu0 %v3387_v8 }
 0x213   : > { %v1616_v9 = vpop.f32.mrb[21].mxu1  ;;  %v4212_v13 = vadd.f32 %v3213_v3, %v4161_v33  ;;  %v1175_v15 = vmul.f32 1.050701, %v1159_v12  ;;  %v2904_v16 = vadd.f32 -1.0, %v3459_v10  ;;  %v3461_v43 = vpop.eup %3460  ;;  %vm1665_vm2 = vcmp.gt.f32.partialorder %v4174_v45, 0.0  ;;  %v3390_v3 = vld [vmem:[%s5004_s11 + $0x30] sm:$0xff]  }
 0x214   : > { %v3214_v61 = vpop.f32.mrb[22].mxu1  ;;  %v4218_v54 = vadd.f32 %v4161_v33, %v1616_v9  ;;  %v1148_v59 = vmul.f32 1.6732632, %v2906_v6  ;;  %v3463_v57 = vpop.eup %3462  ;;  %v1174_v17 = vmul.f32 1.050701, %v1158_v14  ;;  %v2907_v34 = vadd.f32 -1.0, %v3461_v43 }
 0x215   : > { %v1619_v18 = vpop.f32.mrb[23].mxu1  ;;  %v1691_v21 = vmul.f32 1.442695, %v4212_v13  ;;  %v4222_v23 = vadd.f32 %v3214_v61, %v4161_v33  ;;  %v1146_v26 = vmul.f32 1.6732632, %v2904_v16  ;;  %v2905_v25 = vadd.f32 -1.0, %v3463_v57  ;;  %3230 = vmatpush3.bf16.msra.mxu0 %v3387_v8 }
 0x216   : > { %v1687_v28 = vmul.f32 1.442695, %v4218_v54  ;;  %v1176_v29 = vmul.f32 1.050701, %v1160_v4  ;;  %v1164_v39 = vsel %vm1084_vm14, %v4139_v52, %v1148_v59  ;;  %v1149_v40 = vmul.f32 1.6732632, %v2907_v34  ;;  %3231 = vmatprep.subr.bf16.mxu0 %v3388_v24 }
 0x217   : > { %3472 = vpow2.f32 %v1691_v21  ;;  %v1693_v7 = vmul.f32 1.442695, %v4222_v23  ;;  %v4235_v42 = vadd.f32 %v4161_v33, %v1619_v18  ;;  %v1186_v36 = vpack.c.bf16 %v1175_v15, %v1174_v17  ;;  %v3391_v12 = vld [vmem:[%s5004_s11 + $0x38] sm:$0xff]  }
 0x218   : > { %3474 = vpow2.f32 %v1687_v28  ;;  %v1147_v47 = vmul.f32 1.6732632, %v2905_v25  ;;  %v1187_v49 = vpack.c.bf16 %v1177_v27, %v1176_v29  ;;  %v1162_v52 = vsel %vm1082_vm15, %v4142_v20, %v1146_v26 }
 0x219   : > { %v3465_v35 = vpop.eup %3464  ;;  %3476 = vpow2.f32 %v1693_v7  ;;  %vm1663_vm3 = vcmp.gt.f32.partialorder %v4177_v46, 0.0  ;;  %vm1666_vm4 = vcmp.gt.f32.partialorder %v4180_v5, 0.0  ;;  %v1689_v41 = vmul.f32 1.442695, %v4235_v42  ;;  %3193 = vmatprep.mubr.bf16.mxu0 %v1186_v36  ;;  %3232 = vmatpush3.bf16.msra.mxu0 %v3388_v24 }
 0x21a   : > { %v3217_v32 = vpop.f32.mrb[24].mxu1  ;;  %v2955_v48 = vadd.f32 -1.0, %v3465_v35  ;;  %v3467_v50 = vpop.eup %3466  ;;  %v1165_v58 = vsel %vm1085_vm0, %v4153_v30, %v1149_v40  ;;  %vm1664_vm5 = vcmp.gt.f32.partialorder %v4193_v63, 0.0  ;;  %3194 = vmatmul.mubr.bf16.gmra.mrb[24].mxu0 %v1187_v49  ;;  %v4253_v44 = vmul.f32 1.050701, %v1164_v39  ;;  %3233 = vmatprep.subr.bf16.mxu0 %v3389_v38 }
 0x21b   : > { %v1632_v19 = vpop.f32.mrb[25].mxu1  ;;  %v4247_v53 = vadd.f32 %v3217_v32, %v4161_v33  ;;  %v3469_v56 = vpop.eup %3468  ;;  %v2953_v51 = vadd.f32 -1.0, %v3467_v50  ;;  %v1163_v60 = vsel %vm1083_vm1, %v4156_v31, %v1147_v47  ;;  %3478 = vpow2.f32 %v1689_v41 }
 0x21c   : > { %v3218_v55 = vpop.f32.mrb[26].mxu1  ;;  %v1729_v22 = vmul.f32 1.6732632, %v2955_v48  ;;  %v2956_v62 = vadd.f32 -1.0, %v3469_v56  ;;  %v1178_v0 = vmul.f32 1.050701, %v1162_v52  ;;  %v4263_v2 = vadd.f32 %v4161_v33, %v1632_v19  ;;  %v3471_v4 = vpop.eup %3470 }
 0x21d   : > { %v1635_v20 = vpop.f32.mrb[27].mxu1  ;;  %v1699_v1 = vmul.f32 1.442695, %v4247_v53  ;;  %v1181_v31 = vmul.f32 1.050701, %v1165_v58  ;;  %v4269_v8 = vadd.f32 %v3218_v55, %v4161_v33  ;;  %v2954_v11 = vadd.f32 -1.0, %v3471_v4  ;;  %3234 = vmatpush3.bf16.msra.mxu0 %v3389_v38 }
 0x21e   : > { %v1745_v30 = vsel %vm1665_vm2, %v4174_v45, %v1729_v22  ;;  %v1730_v6 = vmul.f32 1.6732632, %v2956_v62  ;;  %v4272_v9 = vadd.f32 %v4161_v33, %v1635_v20  ;;  %v1179_v45 = vmul.f32 1.050701, %v1163_v60  ;;  %3235 = vmatprep.subr.bf16.mxu0 %v3390_v3 }
 0x21f   : > { %v1727_v10 = vmul.f32 1.6732632, %v2953_v51  ;;  %3480 = vpow2.f32 %v1699_v1  ;;  %v4277_v61 = vmul.f32 1.050701, %v1745_v30  ;;  %vm1669_vm6 = vcmp.gt.f32.partialorder %v4212_v13, 0.0 }
 0x220   : > { %v1746_v14 = vsel %vm1666_vm4, %v4180_v5, %v1730_v6  ;;  %v1695_v15 = vmul.f32 1.442695, %v4263_v2  ;;  %v1728_v21 = vmul.f32 1.6732632, %v2954_v11  ;;  %vm1667_vm7 = vcmp.gt.f32.partialorder %v4218_v54, 0.0 }
 0x221   : > { %v3473_v37 = vpop.eup %3472  ;;  %v4284_v59 = vmul.f32 1.050701, %v1746_v14  ;;  %v1701_v27 = vmul.f32 1.442695, %v4269_v8  ;;  %v1697_v5 = vmul.f32 1.442695, %v4272_v9  ;;  %v1743_v17 = vsel %vm1663_vm3, %v4177_v46, %v1727_v10  ;;  %3236 = vmatpush3.bf16.msra.mxu0 %v3390_v3 }
 0x222   : > { %v3221_v16 = vpop.f32.mrb[28].mxu1  ;;  %v3475_v18 = vpop.eup %3474  ;;  %v2959_v24 = vadd.f32 -1.0, %v3473_v37  ;;  %3482 = vpow2.f32 %v1695_v15  ;;  %v1188_v29 = vpack.c.bf16 %v1179_v45, %v1178_v0  ;;  %v1744_v7 = vsel %vm1664_vm5, %v4193_v63, %v1728_v21  ;;  %3237 = vmatprep.subr.bf16.mxu0 %v3391_v12 }
 0x223   : > { %v2957_v43 = vadd.f32 -1.0, %v3475_v18  ;;  %v1648_v28 = vpop.f32.mrb[29].mxu1  ;;  %v3477_v57 = vpop.eup %3476  ;;  %v1776_v26 = vpack.c.bf16 %v4284_v59, %v4277_v61  ;;  %3484 = vpow2.f32 %v1701_v27  ;;  %vm1670_vm8 = vcmp.gt.f32.partialorder %v4222_v23, 0.0 }
 0x224   : > { %v1733_v34 = vmul.f32 1.6732632, %v2959_v24  ;;  %v3222_v25 = vpop.f32.mrb[30].mxu1  ;;  %v2960_v39 = vadd.f32 -1.0, %v3477_v57  ;;  %3486 = vpow2.f32 %v1697_v5  ;;  %3197 = vmatprep.mubr.bf16.mxu0 %v1188_v29  ;;  %v1189_v46 = vpack.c.bf16 %v1181_v31, %v4253_v44 }
 0x225   : > { %v1731_v35 = vmul.f32 1.6732632, %v2957_v43  ;;  %v1651_v40 = vpop.f32.mrb[31].mxu1  ;;  %v4300_v36 = vadd.f32 %v3221_v16, %v4161_v33  ;;  %v3479_v32 = vpop.eup %3478  ;;  %v1759_v47 = vmul.f32 1.050701, %v1743_v17  ;;  %vm1668_vm9 = vcmp.gt.f32.partialorder %v4235_v42, 0.0  ;;  %3238 = vmatpush3.bf16.msra.mxu0 %v3391_v12 }
 0x226   : > { %v1734_v48 = vmul.f32 1.6732632, %v2960_v39  ;;  %v4304_v63 = vadd.f32 %v4161_v33, %v1648_v28  ;;  %v1760_v49 = vmul.f32 1.050701, %v1744_v7  ;;  %v1749_v38 = vsel %vm1669_vm6, %v4212_v13, %v1733_v34  ;;  %3198 = vmatmul.mubr.bf16.gmra.mrb[28].mxu0 %v1189_v46 }
 0x227   : > { %v2958_v19 = vadd.f32 -1.0, %v3479_v32  ;;  %v1707_v50 = vmul.f32 1.442695, %v4300_v36  ;;  %v1747_v52 = vsel %vm1667_vm7, %v4218_v54, %v1731_v35  ;;  %v4318_v56 = vadd.f32 %v3222_v25, %v4161_v33 }
 0x228   : > { %v1750_v41 = vsel %vm1670_vm8, %v4222_v23, %v1734_v48  ;;  %v1703_v55 = vmul.f32 1.442695, %v4304_v63  ;;  %v4321_v51 = vadd.f32 %v4161_v33, %v1651_v40  ;;  %v1765_v20 = vmul.f32 1.050701, %v1749_v38  ;;  %v3393_v38 = vld [vmem:[%s5006_s13 + $0x8] sm:$0xff]  }
 0x229   : > { %v3481_v58 = vpop.eup %3480  ;;  %v1766_v13 = vmul.f32 1.050701, %v1750_v41  ;;  %v1732_v22 = vmul.f32 1.6732632, %v2958_v19  ;;  %3488 = vpow2.f32 %v1707_v50  ;;  %v1709_v54 = vmul.f32 1.442695, %v4318_v56 }
 0x22a   : > { %v2963_v44 = vadd.f32 -1.0, %v3481_v58  ;;  %3490 = vpow2.f32 %v1703_v55  ;;  %v1705_v60 = vmul.f32 1.442695, %v4321_v51  ;;  %v1775_v62 = vpack.c.bf16 %v1760_v49, %v1759_v47  ;;  %v3394_v19 = vld [vmem:[%s5006_s13 + $0x10] sm:$0xff]   ;;  %v3395_v50 = vld [vmem:[%s5006_s13 + $0x18] sm:$0xff]   ;;  %v3397_v41 = vld [vmem:[%s5006_s13 + $0x28] sm:$0xff]  }
 0x22b   : > { %v1748_v23 = vsel %vm1668_vm9, %v4235_v42, %v1732_v22  ;;  %v1763_v30 = vmul.f32 1.050701, %v1747_v52  ;;  %3492 = vpow2.f32 %v1709_v54  ;;  %v1778_v3 = vpack.c.bf16 %v1766_v13, %v1765_v20  ;;  %v3396_v52 = vld [vmem:[%s5006_s13 + $0x20] sm:$0xff]   ;;  %v3398_v55 = vld [vmem:[%s5006_s13 + $0x30] sm:$0xff]  }
 0x22c   : > { %v3483_v0 = vpop.eup %3482  ;;  %v1764_v1 = vmul.f32 1.050701, %v1748_v23  ;;  %v1737_v4 = vmul.f32 1.6732632, %v2963_v44  ;;  %3494 = vpow2.f32 %v1705_v60  ;;  %3239 = vmatprep.mubr.bf16.mxu0 %v1775_v62  ;;  %vm1673_vm10 = vcmp.gt.f32.partialorder %v4247_v53, 0.0 }
 0x22d   : > { %v2961_v33 = vadd.f32 -1.0, %v3483_v0  ;;  %v3485_v31 = vpop.eup %3484  ;;  %vm1671_vm11 = vcmp.gt.f32.partialorder %v4263_v2, 0.0  ;;  %vm1674_vm12 = vcmp.gt.f32.partialorder %v4269_v8, 0.0  ;;  %vm1672_vm13 = vcmp.gt.f32.partialorder %v4272_v9, 0.0  ;;  %v4371_v58 = vld [vmem:[%s5001_s8] ss:$0 sm:$0xff] }
 0x22e   : > { %v1777_v6 = vpack.c.bf16 %v1764_v1, %v1763_v30  ;;  %v3487_v45 = vpop.eup %3486  ;;  %v2964_v11 = vadd.f32 -1.0, %v3485_v31  ;;  %3240 = vmatmul.mubr.bf16.vlgmr.msra.gmra.mrb[32].mxu0 %v1776_v26  ;;  %v1753_v12 = vsel %vm1673_vm10, %v4247_v53, %v1737_v4  ;;  %vm1677_vm14 = vcmp.gt.f32.partialorder %v4300_v36, 0.0 }
 0x22f   : > { %v1735_v10 = vmul.f32 1.6732632, %v2961_v33  ;;  %v2962_v42 = vadd.f32 -1.0, %v3487_v45  ;;  %v1769_v59 = vmul.f32 1.050701, %v1753_v12  ;;  %vm1675_vm15 = vcmp.gt.f32.partialorder %v4304_v63, 0.0 }
 0x230   : > { %3243 = vmatprep.mubr.bf16.mxu0 %v1777_v6  ;;  %v1738_v37 = vmul.f32 1.6732632, %v2964_v11  ;;  %vm1678_vm0 = vcmp.gt.f32.partialorder %v4318_v56, 0.0  ;;  %vm1676_vm1 = vcmp.gt.f32.partialorder %v4321_v51, 0.0 }
 0x231   : > { %v1751_v61 = vsel %vm1671_vm11, %v4263_v2, %v1735_v10  ;;  %v1736_v14 = vmul.f32 1.6732632, %v2962_v42 }
 0x232   : > { %v1754_v16 = vsel %vm1674_vm12, %v4269_v8, %v1738_v37  ;;  %v1767_v53 = vmul.f32 1.050701, %v1751_v61 }
 0x233   : > { %v3489_v15 = vpop.eup %3488  ;;  %v1770_v21 = vmul.f32 1.050701, %v1754_v16  ;;  %v1752_v24 = vsel %vm1672_vm13, %v4272_v9, %v1736_v14 }
 0x234   : > { %v3491_v18 = vpop.eup %3490  ;;  %v2967_v43 = vadd.f32 -1.0, %v3489_v15  ;;  %v1768_v27 = vmul.f32 1.050701, %v1752_v24 }
 0x235   : > { %v2965_v5 = vadd.f32 -1.0, %v3491_v18  ;;  %v3493_v28 = vpop.eup %3492  ;;  %v1780_v2 = vpack.c.bf16 %v1770_v21, %v1769_v59  ;;  %v2370_v18 = vpop.permute.xlu0 %2369 }
 0x236   : > { %v1741_v57 = vmul.f32 1.6732632, %v2967_v43  ;;  %v3495_v17 = vpop.eup %3494  ;;  %v2968_v34 = vadd.f32 -1.0, %v3493_v28  ;;  %3244 = vmatmul.mubr.bf16.gmra.mrb[36].mxu0 %v1778_v3  ;;  %v1779_v29 = vpack.c.bf16 %v1768_v27, %v1767_v53  ;;  %v2380_v53 = vpop.permute.xlu1 %2379 }
 0x237   : > { %v1739_v26 = vmul.f32 1.6732632, %v2965_v5  ;;  %v2966_v8 = vadd.f32 -1.0, %v3495_v17 }
 0x238   : > { %v1757_v25 = vsel %vm1677_vm14, %v4300_v36, %v1741_v57  ;;  %v1742_v9 = vmul.f32 1.6732632, %v2968_v34  ;;  %3247 = vmatprep.mubr.bf16.mxu0 %v1779_v29 }
 0x239   : > { %v1755_v7 = vsel %vm1675_vm15, %v4304_v63, %v1739_v26  ;;  %v1740_v35 = vmul.f32 1.6732632, %v2966_v8  ;;  %v1773_v40 = vmul.f32 1.050701, %v1757_v25  ;;  %v3392_v63 = vld [vmem:[%s5006_s13] sm:$0xff]  }
 0x23a   : > { %v1758_v39 = vsel %vm1678_vm0, %v4318_v56, %v1742_v9  ;;  %v1771_v47 = vmul.f32 1.050701, %v1755_v7  ;;  %3255 = vmatprep.subr.bf16.mxu0 %v3392_v63  ;;  %3287 = vmatprep.subr.bf16.mxu1 %v3392_v63  ;;  %v3399_v56 = vld [vmem:[%s5006_s13 + $0x38] sm:$0xff]  }
 0x23b   : > { %v1774_v46 = vmul.f32 1.050701, %v1758_v39  ;;  %v1756_v32 = vsel %vm1676_vm1, %v4321_v51, %v1740_v35  ;;  %3256 = vmatpush3.bf16.msra.mxu0 %v3392_v63  ;;  %3295 = vmatpush3.bf16.msra.mxu1 %v3392_v63 }
 0x23c   : > { %v1772_v48 = vmul.f32 1.050701, %v1756_v32  ;;  %3257 = vmatprep.subr.bf16.mxu0 %v3393_v38  ;;  %3288 = vmatprep.subr.bf16.mxu1 %v3393_v38 }
 0x23d   : > { %v1782_v36 = vpack.c.bf16 %v1774_v46, %v1773_v40  ;;  %v2375_v40 = vpop.permute.xlu0 %2374 }
 0x23e   : > { %3248 = vmatmul.mubr.bf16.gmra.mrb[40].mxu0 %v1780_v2  ;;  %v1781_v49 = vpack.c.bf16 %v1772_v48, %v1771_v47  ;;  %v2385_v47 = vpop.permute.xlu1 %2384 }
 0x23f   : > { %3258 = vmatpush3.bf16.msra.mxu0 %v3393_v38  ;;  %3296 = vmatpush3.bf16.msra.mxu1 %v3393_v38 }
 0x240   : > { %3251 = vmatprep.mubr.bf16.mxu0 %v1781_v49  ;;  %3259 = vmatprep.subr.bf16.mxu0 %v3394_v19 }
 0x241   : > { %3289 = vmatprep.subr.bf16.mxu1 %v3394_v19 }
 0x243   : > { %3260 = vmatpush3.bf16.msra.mxu0 %v3394_v19  ;;  %3297 = vmatpush3.bf16.msra.mxu1 %v3394_v19 }
 0x244   : > { %3261 = vmatprep.subr.bf16.mxu0 %v3395_v50  ;;  %3290 = vmatprep.subr.bf16.mxu1 %v3395_v50 }
 0x246   : > { %3252 = vmatmul.mubr.bf16.gmra.mrb[44].mxu0 %v1782_v36 }
 0x247   : > { %3262 = vmatpush3.bf16.msra.mxu0 %v3395_v50  ;;  %3298 = vmatpush3.bf16.msra.mxu1 %v3395_v50 }
 0x248   : > { %3263 = vmatprep.subr.bf16.mxu0 %v3396_v52  ;;  %3291 = vmatprep.subr.bf16.mxu1 %v3396_v52 }
 0x24b   : > { %3264 = vmatpush3.bf16.msra.mxu0 %v3396_v52  ;;  %3299 = vmatpush3.bf16.msra.mxu1 %v3396_v52 }
 0x24c   : > { %3265 = vmatprep.subr.bf16.mxu0 %v3397_v41  ;;  %3292 = vmatprep.subr.bf16.mxu1 %v3397_v41 }
 0x24f   : > { %3266 = vmatpush3.bf16.msra.mxu0 %v3397_v41  ;;  %3300 = vmatpush3.bf16.msra.mxu1 %v3397_v41 }
 0x250   : > { %3267 = vmatprep.subr.bf16.mxu0 %v3398_v55  ;;  %3293 = vmatprep.subr.bf16.mxu1 %v3398_v55 }
 0x253   : > { %3268 = vmatpush3.bf16.msra.mxu0 %v3398_v55  ;;  %3301 = vmatpush3.bf16.msra.mxu1 %v3398_v55 }
 0x254   : > { %3269 = vmatprep.subr.bf16.mxu0 %v3399_v56  ;;  %3294 = vmatprep.subr.bf16.mxu1 %v3399_v56 }
 0x257   : > { %3270 = vmatpush3.bf16.msra.mxu0 %v3399_v56  ;;  %3302 = vmatpush3.bf16.msra.mxu1 %v3399_v56 }
 0x2da   : > { %v3187_v13 = vpop.f32.mrb[16].mxu0 }
 0x2db   : > { %v1304_v22 = vadd.f32 %v3187_v13, %v4371_v58  ;;  %v1295_v51 = vpop.f32.mrb[17].mxu0 }
 0x2dc   : > { %v1296_v20 = vadd.f32 %v4371_v58, %v1295_v51  ;;  %v3188_v44 = vpop.f32.mrb[18].mxu0 }
 0x2dd   : > { %v1378_v54 = vmul.f32 1.442695, %v1304_v22  ;;  %v1307_v23 = vadd.f32 %v3188_v44, %v4371_v58  ;;  %v1298_v60 = vpop.f32.mrb[19].mxu0  ;;  %vm1360_vm2 = vcmp.gt.f32.partialorder %v1304_v22, 0.0 }
 0x2de   : > { %v1374_v62 = vmul.f32 1.442695, %v1296_v20  ;;  %v1299_v0 = vadd.f32 %v4371_v58, %v1298_v60  ;;  %vm1358_vm3 = vcmp.gt.f32.partialorder %v1296_v20, 0.0 }
 0x2df   : > { %3496 = vpow2.f32 %v1378_v54  ;;  %v1380_v30 = vmul.f32 1.442695, %v1307_v23  ;;  %vm1361_vm4 = vcmp.gt.f32.partialorder %v1307_v23, 0.0 }
 0x2e0   : > { %3498 = vpow2.f32 %v1374_v62  ;;  %v1376_v1 = vmul.f32 1.442695, %v1299_v0  ;;  %vm1359_vm5 = vcmp.gt.f32.partialorder %v1299_v0, 0.0 }
 0x2e1   : > { %3500 = vpow2.f32 %v1380_v30  ;;  %v2390_v30 = vpop.permute.xlu0 %2389 }
 0x2e2   : > { %3502 = vpow2.f32 %v1376_v1 }
 0x2e3   : > { %v3191_v3 = vpop.f32.mrb[20].mxu0 }
 0x2e4   : > { %v4378_v4 = vadd.f32 %v3191_v3, %v4371_v58  ;;  %v1311_v33 = vpop.f32.mrb[21].mxu0 }
 0x2e5   : > { %v4381_v31 = vadd.f32 %v4371_v58, %v1311_v33  ;;  %v3192_v6 = vpop.f32.mrb[22].mxu0 }
 0x2e6   : > { %v1386_v45 = vmul.f32 1.442695, %v4378_v4  ;;  %v4385_v10 = vadd.f32 %v3192_v6, %v4371_v58  ;;  %v1314_v11 = vpop.f32.mrb[23].mxu0  ;;  %vm1364_vm7 = vcmp.gt.f32.partialorder %v4378_v4, 0.0  ;;  %v2395_v6 = vpop.permute.xlu1 %2394 }
 0x2e7   : > { %v1382_v42 = vmul.f32 1.442695, %v4381_v31  ;;  %v4389_v12 = vadd.f32 %v4371_v58, %v1314_v11  ;;  %vm1362_vm6 = vcmp.gt.f32.partialorder %v4381_v31, 0.0 }
 0x2e8   : > { %3504 = vpow2.f32 %v1386_v45  ;;  %v1388_v37 = vmul.f32 1.442695, %v4385_v10  ;;  %vm1365_vm9 = vcmp.gt.f32.partialorder %v4385_v10, 0.0 }
 0x2e9   : > { %3506 = vpow2.f32 %v1382_v42  ;;  %v1384_v61 = vmul.f32 1.442695, %v4389_v12  ;;  %v3497_v14 = vpop.eup %3496  ;;  %vm1363_vm8 = vcmp.gt.f32.partialorder %v4389_v12, 0.0 }
 0x2ea   : > { %3508 = vpow2.f32 %v1388_v37  ;;  %v3499_v15 = vpop.eup %3498  ;;  %v2919_v59 = vadd.f32 -1.0, %v3497_v14 }
 0x2eb   : > { %3510 = vpow2.f32 %v1384_v61  ;;  %v3501_v21 = vpop.eup %3500  ;;  %v2917_v43 = vadd.f32 -1.0, %v3499_v15 }
 0x2ec   : > { %v3503_v27 = vpop.eup %3502  ;;  %v1424_v57 = vmul.f32 1.6732632, %v2919_v59  ;;  %v2920_v2 = vadd.f32 -1.0, %v3501_v21 }
 0x2ed   : > { %v3195_v16 = vpop.f32.mrb[24].mxu0  ;;  %v1422_v17 = vmul.f32 1.6732632, %v2917_v43  ;;  %v2918_v34 = vadd.f32 -1.0, %v3503_v27 }
 0x2ee   : > { %v1327_v24 = vpop.f32.mrb[25].mxu0  ;;  %v1440_v8 = vsel %vm1360_vm2, %v1304_v22, %v1424_v57  ;;  %v1425_v25 = vmul.f32 1.6732632, %v2920_v2  ;;  %v4410_v60 = vadd.f32 %v3195_v16, %v4371_v58 }
 0x2ef   : > { %v4394_v5 = vadd.f32 %v4371_v58, %v1327_v24  ;;  %v3196_v28 = vpop.f32.mrb[26].mxu0  ;;  %v1438_v9 = vsel %vm1358_vm3, %v1296_v20, %v1422_v17  ;;  %v1456_v39 = vmul.f32 1.050701, %v1440_v8  ;;  %v1423_v46 = vmul.f32 1.6732632, %v2918_v34  ;;  %v2405_v34 = vpop.permute.xlu1 %2404 }
 0x2f0   : > { %v1330_v26 = vpop.f32.mrb[27].mxu0  ;;  %v1454_v35 = vmul.f32 1.050701, %v1438_v9  ;;  %v1441_v48 = vsel %vm1361_vm4, %v1307_v23, %v1425_v25  ;;  %v4425_v11 = vadd.f32 %v3196_v28, %v4371_v58  ;;  %v1394_v59 = vmul.f32 1.442695, %v4410_v60 }
 0x2f1   : > { %v1390_v29 = vmul.f32 1.442695, %v4394_v5  ;;  %v4398_v7 = vadd.f32 %v4371_v58, %v1330_v26  ;;  %v1439_v49 = vsel %vm1359_vm5, %v1299_v0, %v1423_v46  ;;  %v1457_v63 = vmul.f32 1.050701, %v1441_v48  ;;  %v2400_v26 = vpop.permute.xlu0 %2399 }
 0x2f2   : > { %v3505_v32 = vpop.eup %3504  ;;  %v1455_v50 = vmul.f32 1.050701, %v1439_v49  ;;  %v4401_v56 = vadd.f32 %v2370_v18, %v1454_v35  ;;  %v4403_v13 = vadd.f32 %v2380_v53, %v1456_v39  ;;  %v4439_v53 = vld [vmem:[%s5005_s12] ss:$0 sm:$0xff]  ;;  %v1396_v28 = vmul.f32 1.442695, %v4425_v11 }
 0x2f3   : > { %v3507_v36 = vpop.eup %3506  ;;  %3512 = vpow2.f32 %v1390_v29  ;;  %v1392_v19 = vmul.f32 1.442695, %v4398_v7  ;;  %v2923_v41 = vadd.f32 -1.0, %v3505_v32  ;;  %v4405_v22 = vadd.f32 %v2385_v47, %v1457_v63 }
 0x2f4   : > { %v3509_v38 = vpop.eup %3508  ;;  %v2921_v52 = vadd.f32 -1.0, %v3507_v36  ;;  %v4407_v20 = vadd.f32 %v2375_v40, %v1455_v50  ;;  %vm1366_vm10 = vcmp.gt.f32.partialorder %v4394_v5, 0.0  ;;  %vm1367_vm11 = vcmp.gt.f32.partialorder %v4398_v7, 0.0 }
 0x2f5   : > { %v3511_v55 = vpop.eup %3510  ;;  %v2924_v51 = vadd.f32 -1.0, %v3509_v38  ;;  %v1428_v23 = vmul.f32 1.6732632, %v2923_v41  ;;  %v2470_v62 = vmax.f32 %v4403_v13, %v4405_v22  ;;  %3514 = vpow2.f32 %v1392_v19 }
 0x2f6   : > { %v1426_v44 = vmul.f32 1.6732632, %v2921_v52  ;;  %v2922_v54 = vadd.f32 -1.0, %v3511_v55  ;;  %v2463_v1 = vmax.f32 %v4401_v56, %v4407_v20  ;;  %3516 = vpow2.f32 %v1394_v59 }
 0x2f7   : > { %v2471_v42 = vrot.slane %v2470_v62, 4  ;;  %v1429_v61 = vmul.f32 1.6732632, %v2924_v51  ;;  %3518 = vpow2.f32 %v1396_v28  ;;  %vm1368_vm12 = vcmp.gt.f32.partialorder %v4410_v60, 0.0 }
 0x2f8   : > { %v1442_v33 = vsel %vm1362_vm6, %v4381_v31, %v1426_v44  ;;  %v1427_v45 = vmul.f32 1.6732632, %v2922_v54  ;;  %v2464_v14 = vrot.slane %v2463_v1, 4  ;;  %v1444_v31 = vsel %vm1364_vm7, %v4378_v4, %v1428_v23 }
 0x2f9   : > { %v4414_v0 = vpop.f32.mrb[28].mxu0  ;;  %v1458_v15 = vmul.f32 1.050701, %v1442_v33  ;;  %v2472_v21 = vmax.f32 %v2470_v62, %v2471_v42  ;;  %v1460_v2 = vmul.f32 1.050701, %v1444_v31  ;;  %v1445_v29 = vsel %vm1365_vm9, %v4385_v10, %v1429_v61 }
 0x2fa   : > { %v4420_v3 = vpop.f32.mrb[29].mxu0  ;;  %v1443_v18 = vsel %vm1363_vm8, %v4389_v12, %v1427_v45  ;;  %v2465_v24 = vmax.f32 %v2463_v1, %v2464_v14  ;;  %v1461_v25 = vmul.f32 1.050701, %v1445_v29  ;;  %vm1369_vm13 = vcmp.gt.f32.partialorder %v4425_v11, 0.0 }
 0x2fb   : > { %v4427_v37 = vpop.f32.mrb[30].mxu0  ;;  %v1459_v43 = vmul.f32 1.050701, %v1443_v18  ;;  %v2473_v57 = vrot.slane %v2472_v21, 2  ;;  %v4443_v17 = vadd.f32 %v2390_v30, %v1458_v15  ;;  %v4455_v47 = vadd.f32 %v2400_v26, %v1460_v2 }
 0x2fc   : > { %v4429_v16 = vpop.f32.mrb[31].mxu0  ;;  %v2466_v12 = vrot.slane %v2465_v24, 2  ;;  %v4457_v48 = vadd.f32 %v2405_v34, %v1461_v25  ;;  %v4480_v28 = vadd.f32 %v4371_v58, %v4420_v3 }
 0x2fd   : > { %v3513_v27 = vpop.eup %3512  ;;  %v4445_v4 = vadd.f32 %v2395_v6, %v1459_v43  ;;  %v2474_v8 = vmax.f32 %v2472_v21, %v2473_v57 }
 0x2fe   : > { %v2467_v35 = vmax.f32 %v2465_v24, %v2466_v12  ;;  %v2925_v38 = vadd.f32 -1.0, %v3513_v27  ;;  %v2484_v41 = vmax.f32 %v4455_v47, %v4457_v48  ;;  %vm1370_vm0 = vcmp.gt.f32.partialorder %v4480_v28, 0.0 }
 0x2ff   : > { %v2477_v39 = vmax.f32 %v4443_v17, %v4445_v4  ;;  %v2475_v32 = vrot.slane %v2474_v8, 1  ;;  %v3515_v50 = vpop.eup %3514 }
 0x300   : > { %v2468_v36 = vrot.slane %v2467_v35, 1  ;;  %v2485_v23 = vrot.slane %v2484_v41, 4  ;;  %v1430_v33 = vmul.f32 1.6732632, %v2925_v38  ;;  %v2926_v61 = vadd.f32 -1.0, %v3515_v50  ;;  %v3517_v59 = vpop.eup %3516  ;;  %v2410_v50 = vpop.permute.xlu0 %2409 }
 0x301   : > { %v3241_v9 = vpop.f32.mrb[32].mxu0  ;;  %v2478_v49 = vrot.slane %v2477_v39, 4  ;;  %v2476_v52 = vmax.f32 %v2474_v8, %v2475_v32  ;;  %v3519_v27 = vpop.eup %3518  ;;  %v2927_v34 = vadd.f32 -1.0, %v3517_v59 }
 0x302   : > { %v4451_v40 = vadd.f32 %v3241_v9, %v4439_v53  ;;  %v4453_v46 = vpop.f32.mrb[33].mxu0  ;;  %v2469_v55 = vmax.f32 %v2467_v35, %v2468_v36  ;;  %v2486_v42 = vmax.f32 %v2484_v41, %v2485_v23  ;;  %v1446_v21 = vsel %vm1366_vm10, %v4394_v5, %v1430_v33 }
 0x303   : > { %v3242_v10 = vpop.f32.mrb[34].mxu0  ;;  %v2479_v51 = vmax.f32 %v2477_v39, %v2478_v49  ;;  %v2521_v44 = vsub.f32 %v4403_v13, %v2476_v52  ;;  %v2522_v54 = vsub.f32 %v4405_v22, %v2476_v52  ;;  %v1431_v26 = vmul.f32 1.6732632, %v2926_v61  ;;  %v2415_v52 = vpop.permute.xlu1 %2414 }
 0x304   : > { %v1971_v63 = vmul.f32 1.442695, %v4451_v40  ;;  %v4460_v19 = vpop.f32.mrb[35].mxu0  ;;  %v2519_v62 = vsub.f32 %v4401_v56, %v2469_v55  ;;  %v2520_v30 = vsub.f32 %v4407_v20, %v2469_v55  ;;  %v4469_v31 = vadd.f32 %v3242_v10, %v4439_v53  ;;  %v2420_v59 = vpop.permute.xlu0 %2419 }
 0x305   : > { %v2480_v1 = vrot.slane %v2479_v51, 2  ;;  %v2539_v6 = vmul.f32 1.442695, %v2521_v44  ;;  %v2541_v45 = vmul.f32 1.442695, %v2522_v54  ;;  %v2487_v22 = vrot.slane %v2486_v42, 2 }
 0x306   : > { %3520 = vpow2.f32 %v1971_v63  ;;  %v2535_v14 = vmul.f32 1.442695, %v2519_v62  ;;  %v2537_v15 = vmul.f32 1.442695, %v2520_v30  ;;  %v1973_v24 = vmul.f32 1.442695, %v4469_v31 }
 0x307   : > { %v2481_v18 = vmax.f32 %v2479_v51, %v2480_v1  ;;  %3522 = vpow2.f32 %v2539_v6  ;;  %v2488_v57 = vmax.f32 %v2486_v42, %v2487_v22  ;;  %v1462_v8 = vmul.f32 1.050701, %v1446_v21  ;;  %v2425_v22 = vpop.permute.xlu1 %2424 }
 0x308   : > { %3524 = vpow2.f32 %v2535_v14  ;;  %v1447_v3 = vsel %vm1367_vm11, %v4398_v7, %v1431_v26  ;;  %v2928_v35 = vadd.f32 -1.0, %v3519_v27  ;;  %v1432_v10 = vmul.f32 1.6732632, %v2927_v34 }
 0x309   : > { %v3245_v13 = vpop.f32.mrb[36].mxu0  ;;  %v2482_v20 = vrot.slane %v2481_v18, 1  ;;  %3526 = vpow2.f32 %v2537_v15  ;;  %v2489_v29 = vrot.slane %v2488_v57, 1  ;;  %v1463_v32 = vmul.f32 1.050701, %v1447_v3 }
 0x30a   : > { %v4472_v56 = vpop.f32.mrb[37].mxu0  ;;  %3528 = vpow2.f32 %v2541_v45  ;;  %v1398_v49 = vmul.f32 1.442695, %v4480_v28  ;;  %v4498_v51 = vadd.f32 %v2410_v50, %v1462_v8  ;;  %v1448_v44 = vsel %vm1368_vm12, %v4410_v60, %v1432_v10 }
 0x30b   : > { %v4476_v43 = vpop.f32.mrb[38].mxu0  ;;  %v2483_v12 = vmax.f32 %v2481_v18, %v2482_v20  ;;  %3530 = vpow2.f32 %v1973_v24  ;;  %v2490_v39 = vmax.f32 %v2488_v57, %v2489_v29  ;;  %v4494_v7 = vadd.f32 %v2415_v52, %v1463_v32 }
 0x30c   : > { %v4482_v2 = vpop.f32.mrb[39].mxu0  ;;  %v1433_v54 = vmul.f32 1.6732632, %v2928_v35  ;;  %v4517_v6 = vadd.f32 %v3245_v13, %v4439_v53  ;;  %v1464_v61 = vmul.f32 1.050701, %v1448_v44  ;;  %v4530_v18 = vadd.f32 %v4414_v0, %v4371_v58 }
 0x30d   : > { %v2523_v25 = vsub.f32 %v4443_v17, %v2483_v12  ;;  %v2524_v9 = vsub.f32 %v4445_v4, %v2483_v12  ;;  %v2525_v17 = vsub.f32 %v4455_v47, %v2490_v39  ;;  %v2526_v4 = vsub.f32 %v4457_v48, %v2490_v39 }
 0x30e   : > { %v4507_v48 = vadd.f32 %v4439_v53, %v4453_v46  ;;  %v2491_v60 = vmax.f32 %v4498_v51, %v4494_v7  ;;  %v1449_v46 = vsel %vm1369_vm13, %v4425_v11, %v1433_v54  ;;  %v4538_v11 = vadd.f32 %v4371_v58, %v4429_v16 }
 0x30f   : > { %v2543_v63 = vmul.f32 1.442695, %v2523_v25  ;;  %v2545_v38 = vmul.f32 1.442695, %v2524_v9  ;;  %v2547_v30 = vmul.f32 1.442695, %v2525_v17  ;;  %v4546_v12 = vadd.f32 %v4439_v53, %v4460_v19 }
 0x310   : > { %v3521_v5 = vpop.eup %3520  ;;  %v2549_v47 = vmul.f32 1.442695, %v2526_v4  ;;  %v2492_v13 = vrot.slane %v2491_v60, 4  ;;  %v1967_v24 = vmul.f32 1.442695, %v4507_v48  ;;  %vm1953_vm14 = vcmp.gt.f32.partialorder %v4451_v40, 0.0 }
 0x311   : > { %v4489_v36 = vpop.f32.mrb[40].mxu0  ;;  %v2980_v41 = vadd.f32 -1.0, %v3521_v5  ;;  %3532 = vpow2.f32 %v2543_v63  ;;  %v4503_v62 = vpop.eup %3522  ;;  %v1465_v27 = vmul.f32 1.050701, %v1449_v46  ;;  %v4551_v8 = vadd.f32 %v2420_v59, %v1464_v61 }
 0x312   : > { %v4496_v55 = vpop.f32.mrb[41].mxu0  ;;  %3534 = vpow2.f32 %v2545_v38  ;;  %v4511_v33 = vpop.eup %3524  ;;  %v2493_v26 = vmax.f32 %v2491_v60, %v2492_v13  ;;  %v1979_v5 = vmul.f32 1.442695, %v4517_v6  ;;  %v1402_v9 = vmul.f32 1.442695, %v4530_v18 }
 0x313   : > { %v4501_v23 = vpop.f32.mrb[42].mxu0  ;;  %3536 = vpow2.f32 %v1398_v49  ;;  %v4519_v45 = vpop.eup %3526  ;;  %v2017_v42 = vmul.f32 1.6732632, %v2980_v41  ;;  %v4553_v16 = vadd.f32 %v2425_v22, %v1465_v27  ;;  %v4561_v3 = vadd.f32 %v4427_v37, %v4371_v58 }
 0x314   : > { %v4509_v1 = vpop.f32.mrb[43].mxu0  ;;  %3538 = vpow2.f32 %v2547_v30  ;;  %v4522_v14 = vpop.eup %3528  ;;  %v4526_v15 = vadd.f32 %v4519_v45, %v4511_v33  ;;  %v2494_v35 = vrot.slane %v2493_v26, 2  ;;  %vm1954_vm15 = vcmp.gt.f32.partialorder %v4469_v31, 0.0 }
 0x315   : > { %3540 = vpow2.f32 %v2549_v47  ;;  %v3531_v20 = vpop.eup %3530  ;;  %v4534_v21 = vadd.f32 %v4522_v14, %v4503_v62  ;;  %v2033_v29 = vsel %vm1953_vm14, %v4451_v40, %v2017_v42  ;;  %v1400_v40 = vmul.f32 1.442695, %v4538_v11 }
 0x316   : > { %v2981_v0 = vadd.f32 -1.0, %v3531_v20  ;;  %3542 = vpow2.f32 %v1967_v24  ;;  %v2498_v32 = vmax.f32 %v4551_v8, %v4553_v16  ;;  %v4571_v49 = vmul.f32 1.050701, %v2033_v29 }
 0x317   : > { %v1969_v58 = vmul.f32 1.442695, %v4546_v12  ;;  %v2495_v37 = vmax.f32 %v2493_v26, %v2494_v35  ;;  %3544 = vpow2.f32 %v1979_v5  ;;  %v4581_v17 = vadd.f32 %v4439_v53, %v4472_v56 }
 0x318   : > { %v2018_v19 = vmul.f32 1.6732632, %v2981_v0  ;;  %v2499_v52 = vrot.slane %v2498_v32, 4  ;;  %v1404_v41 = vmul.f32 1.442695, %v4561_v3  ;;  %3546 = vpow2.f32 %v1400_v40 }
 0x319   : > { %v4541_v57 = vpop.f32.mrb[44].mxu0  ;;  %3548 = vpow2.f32 %v1969_v58  ;;  %v1975_v46 = vmul.f32 1.442695, %v4581_v17  ;;  %v4603_v29 = vadd.f32 %v4476_v43, %v4439_v53  ;;  %v4611_v43 = vadd.f32 %v4439_v53, %v4482_v2 }
 0x31a   : > { %v4548_v34 = vpop.f32.mrb[45].mxu0  ;;  %v2034_v63 = vsel %vm1954_vm15, %v4469_v31, %v2018_v19  ;;  %v2496_v31 = vrot.slane %v2495_v37, 1  ;;  %v2500_v47 = vmax.f32 %v2498_v32, %v2499_v52  ;;  %3550 = vpow2.f32 %v1402_v9 }
 0x31b   : > { %v4556_v25 = vpop.f32.mrb[46].mxu0  ;;  %v4569_v10 = vpop.eup %3532  ;;  %v4577_v50 = vmul.f32 1.050701, %v2034_v63  ;;  %3552 = vpow2.f32 %v1404_v41  ;;  %v1981_v32 = vmul.f32 1.442695, %v4603_v29  ;;  %vm1951_vm1 = vcmp.gt.f32.partialorder %v4507_v48, 0.0 }
 0x31c   : > { %v4563_v39 = vpop.f32.mrb[47].mxu0  ;;  %v4575_v38 = vpop.eup %3534  ;;  %v2497_v56 = vmax.f32 %v2495_v37, %v2496_v31  ;;  %v2501_v61 = vrot.slane %v2500_v47, 2  ;;  %3554 = vpow2.f32 %v1975_v46  ;;  %vm1957_vm2 = vcmp.gt.f32.partialorder %v4517_v6, 0.0 }
 0x31d   : > { %v3537_v4 = vpop.eup %3536  ;;  %v4586_v44 = vadd.f32 %v4575_v38, %v4569_v10  ;;  %v2064_v30 = vpack.c.bf16 %v4577_v50, %v4571_v49  ;;  %vm1371_vm3 = vcmp.gt.f32.partialorder %v4538_v11, 0.0  ;;  %vm1372_vm4 = vcmp.gt.f32.partialorder %v4530_v18, 0.0 }
 0x31e   : > { %v4588_v54 = vpop.eup %3538  ;;  %v2527_v13 = vsub.f32 %v4498_v51, %v2497_v56  ;;  %v2528_v59 = vsub.f32 %v4494_v7, %v2497_v56  ;;  %v2502_v22 = vmax.f32 %v2500_v47, %v2501_v61  ;;  %v2929_v20 = vadd.f32 -1.0, %v3537_v4  ;;  %v2430_v56 = vpop.permute.xlu0 %2429 }
 0x31f   : > { %v4592_v60 = vpop.eup %3540  ;;  %v2435_v61 = vpop.permute.xlu1 %2434  ;;  %vm1952_vm5 = vcmp.gt.f32.partialorder %v4546_v12, 0.0  ;;  %vm1373_vm6 = vcmp.gt.f32.partialorder %v4561_v3, 0.0  ;;  %vm1955_vm7 = vcmp.gt.f32.partialorder %v4581_v17, 0.0  ;;  %vm1958_vm8 = vcmp.gt.f32.partialorder %v4603_v29, 0.0 }
 0x320   : > { %v4596_v42 = vadd.f32 %v4592_v60, %v4588_v54  ;;  %v2551_v24 = vmul.f32 1.442695, %v2527_v13  ;;  %v2553_v27 = vmul.f32 1.442695, %v2528_v59  ;;  %v3543_v0 = vpop.eup %3542  ;;  %v2503_v26 = vrot.slane %v2502_v22, 1 }
 0x321   : > { %v3545_v5 = vpop.eup %3544  ;;  %v1434_v19 = vmul.f32 1.6732632, %v2929_v20  ;;  %v2978_v51 = vadd.f32 -1.0, %v3543_v0  ;;  %vm1956_vm9 = vcmp.gt.f32.partialorder %v4611_v43, 0.0 }
 0x322   : > { %3556 = vpow2.f32 %v2551_v24  ;;  %v2504_v9 = vmax.f32 %v2502_v22, %v2503_v26  ;;  %v3547_v35 = vpop.eup %3546  ;;  %v2984_v58 = vadd.f32 -1.0, %v3545_v5  ;;  %v4620_v24 = vadd.f32 %v4489_v36, %v4439_v53 }
 0x323   : > { %3558 = vpow2.f32 %v2553_v27  ;;  %v3549_v63 = vpop.eup %3548  ;;  %v1450_v41 = vsel %vm1370_vm0, %v4480_v28, %v1434_v19  ;;  %v2930_v46 = vadd.f32 -1.0, %v3547_v35  ;;  %v4627_v26 = vadd.f32 %v4439_v53, %v4496_v55 }
 0x324   : > { %v2529_v7 = vsub.f32 %v4551_v8, %v2504_v9  ;;  %v2530_v40 = vsub.f32 %v4553_v16, %v2504_v9  ;;  %v3551_v37 = vpop.eup %3550  ;;  %3560 = vpow2.f32 %v1981_v32  ;;  %v1977_v8 = vmul.f32 1.442695, %v4611_v43 }
 0x325   : > { %v3553_v31 = vpop.eup %3552  ;;  %v2015_v16 = vmul.f32 1.6732632, %v2978_v51  ;;  %v2979_v47 = vadd.f32 -1.0, %v3549_v63  ;;  %v2021_v2 = vmul.f32 1.6732632, %v2984_v58  ;;  %v2931_v59 = vadd.f32 -1.0, %v3551_v37  ;;  %v2445_v63 = vpop.permute.xlu1 %2444 }
 0x326   : > { %v2555_v52 = vmul.f32 1.442695, %v2529_v7  ;;  %v2557_v4 = vmul.f32 1.442695, %v2530_v40  ;;  %v1466_v13 = vmul.f32 1.050701, %v1450_v41  ;;  %v3555_v22 = vpop.eup %3554  ;;  %v4636_v35 = vadd.f32 %v4501_v23, %v4439_v53  ;;  %v2440_v40 = vpop.permute.xlu0 %2439 }
 0x327   : > { %v1435_v28 = vmul.f32 1.6732632, %v2930_v46  ;;  %v2932_v20 = vadd.f32 -1.0, %v3553_v31  ;;  %v1436_v0 = vmul.f32 1.6732632, %v2931_v59  ;;  %v2982_v37 = vadd.f32 -1.0, %v3555_v22 }
 0x328   : > { %3562 = vpow2.f32 %v2555_v52  ;;  %v1987_v36 = vmul.f32 1.442695, %v4620_v24  ;;  %v1983_v58 = vmul.f32 1.442695, %v4627_v26  ;;  %v4646_v23 = vadd.f32 %v2430_v56, %v1466_v13 }
 0x329   : > { %3564 = vpow2.f32 %v2557_v4  ;;  %v1451_v9 = vsel %vm1371_vm3, %v4538_v11, %v1435_v28  ;;  %v1437_v19 = vmul.f32 1.6732632, %v2932_v20  ;;  %v1452_v55 = vsel %vm1372_vm4, %v4530_v18, %v1436_v0 }
 0x32a   : > { %3566 = vpow2.f32 %v1977_v8  ;;  %v1467_v7 = vmul.f32 1.050701, %v1451_v9  ;;  %v1468_v32 = vmul.f32 1.050701, %v1452_v55  ;;  %v2016_v31 = vmul.f32 1.6732632, %v2979_v47 }
 0x32b   : > { %v1453_v11 = vsel %vm1373_vm6, %v4561_v3, %v1437_v19  ;;  %3568 = vpow2.f32 %v1987_v36  ;;  %v1989_v18 = vmul.f32 1.442695, %v4636_v35  ;;  %v4653_v8 = vadd.f32 %v4439_v53, %v4509_v1 }
 0x32c   : > { %v4622_v27 = vpop.eup %3556  ;;  %v4648_v52 = vadd.f32 %v2435_v61, %v1467_v7  ;;  %v1469_v4 = vmul.f32 1.050701, %v1453_v11  ;;  %3570 = vpow2.f32 %v1983_v58  ;;  %v4657_v59 = vadd.f32 %v2440_v40, %v1468_v32 }
 0x32d   : > { %v4629_v5 = vpop.eup %3558  ;;  %v2031_v47 = vsel %vm1951_vm1, %v4507_v48, %v2015_v16  ;;  %v2037_v13 = vsel %vm1957_vm2, %v4517_v6, %v2021_v2  ;;  %3572 = vpow2.f32 %v1989_v18  ;;  %v1985_v1 = vmul.f32 1.442695, %v4653_v8 }
 0x32e   : > { %v4640_v51 = vadd.f32 %v4629_v5, %v4622_v27  ;;  %v3561_v41 = vpop.eup %3560  ;;  %v2505_v3 = vmax.f32 %v4646_v23, %v4648_v52  ;;  %v4659_v56 = vadd.f32 %v2445_v63, %v1469_v4  ;;  %v2019_v28 = vmul.f32 1.6732632, %v2982_v37 }
 0x32f   : > { %v2985_v46 = vadd.f32 -1.0, %v3561_v41  ;;  %3574 = vpow2.f32 %v1985_v1  ;;  %v2032_v6 = vsel %vm1952_vm5, %v4546_v12, %v2016_v31  ;;  %v4684_v7 = vmul.f32 1.050701, %v2037_v13 }
 0x330   : > { %v2506_v0 = vrot.slane %v2505_v3, 4  ;;  %v2512_v9 = vmax.f32 %v4657_v59, %v4659_v56  ;;  %v4690_v32 = vadd.f32 %v4541_v57, %v4439_v53  ;;  %v2035_v63 = vsel %vm1955_vm7, %v4581_v17, %v2019_v28 }
 0x331   : > { %v2022_v20 = vmul.f32 1.6732632, %v2985_v46  ;;  %v2047_v4 = vmul.f32 1.050701, %v2031_v47  ;;  %v4697_v41 = vadd.f32 %v4439_v53, %v4548_v34  ;;  %v2048_v31 = vmul.f32 1.050701, %v2032_v6 }
 0x332   : > { %v4661_v61 = vpop.eup %3562  ;;  %v2507_v2 = vmax.f32 %v2505_v3, %v2506_v0  ;;  %v2513_v36 = vrot.slane %v2512_v9, 4  ;;  %v2051_v13 = vmul.f32 1.050701, %v2035_v63  ;;  %vm1961_vm10 = vcmp.gt.f32.partialorder %v4620_v24, 0.0 }
 0x333   : > { %v4670_v22 = vpop.eup %3564  ;;  %v2038_v16 = vsel %vm1958_vm8, %v4603_v29, %v2022_v20  ;;  %v1995_v17 = vmul.f32 1.442695, %v4690_v32  ;;  %vm1959_vm11 = vcmp.gt.f32.partialorder %v4627_v26, 0.0  ;;  %vm1962_vm12 = vcmp.gt.f32.partialorder %v4636_v35, 0.0 }
 0x334   : > { %v4676_v19 = vadd.f32 %v4670_v22, %v4661_v61  ;;  %v3567_v48 = vpop.eup %3566  ;;  %v4686_v55 = vmul.f32 1.050701, %v2038_v16  ;;  %v2508_v11 = vrot.slane %v2507_v2, 2  ;;  %v2514_v58 = vmax.f32 %v2512_v9, %v2513_v36 }
 0x335   : > { %v2983_v40 = vadd.f32 -1.0, %v3567_v48  ;;  %v3569_v37 = vpop.eup %3568  ;;  %v1991_v9 = vmul.f32 1.442695, %v4697_v41  ;;  %vm1960_vm13 = vcmp.gt.f32.partialorder %v4653_v8, 0.0  ;;  %3576 = vpow2.f32 %v1995_v17 }
 0x336   : > { %v2066_v12 = vpack.c.bf16 %v4686_v55, %v4684_v7  ;;  %v2509_v18 = vmax.f32 %v2507_v2, %v2508_v11  ;;  %v2515_v46 = vrot.slane %v2514_v58, 2  ;;  %v2988_v3 = vadd.f32 -1.0, %v3569_v37  ;;  %v3571_v57 = vpop.eup %3570 }
 0x337   : > { %v2020_v29 = vmul.f32 1.6732632, %v2983_v40  ;;  %v3573_v34 = vpop.eup %3572  ;;  %v2986_v0 = vadd.f32 -1.0, %v3571_v57  ;;  %3578 = vpow2.f32 %v1991_v9  ;;  %vm1965_vm14 = vcmp.gt.f32.partialorder %v4690_v32, 0.0 }
 0x338   : > { %v2510_v1 = vrot.slane %v2509_v18, 1  ;;  %v2516_v28 = vmax.f32 %v2514_v58, %v2515_v46  ;;  %v2025_v20 = vmul.f32 1.6732632, %v2988_v3  ;;  %v2989_v16 = vadd.f32 -1.0, %v3573_v34 }
 0x339   : > { %v2036_v47 = vsel %vm1956_vm9, %v4611_v43, %v2020_v29  ;;  %v3575_v2 = vpop.eup %3574  ;;  %v2023_v40 = vmul.f32 1.6732632, %v2986_v0  ;;  %v4709_v43 = vadd.f32 %v4556_v25, %v4439_v53  ;;  %v2063_v0 = vpack.c.bf16 %v2048_v31, %v2047_v4 }
 0x33a   : > { %v2511_v48 = vmax.f32 %v2509_v18, %v2510_v1  ;;  %v2517_v6 = vrot.slane %v2516_v28, 1  ;;  %v2052_v36 = vmul.f32 1.050701, %v2036_v47  ;;  %v2041_v37 = vsel %vm1961_vm10, %v4620_v24, %v2025_v20 }
 0x33b   : > { %v2039_v29 = vsel %vm1959_vm11, %v4627_v26, %v2023_v40  ;;  %v2026_v18 = vmul.f32 1.6732632, %v2989_v16  ;;  %v2987_v46 = vadd.f32 -1.0, %v3575_v2  ;;  %v2057_v17 = vmul.f32 1.050701, %v2041_v37  ;;  %3271 = vmatprep.mubr.bf16.mxu0 %v2063_v0 }
 0x33c   : > { %v2531_v63 = vsub.f32 %v4646_v23, %v2511_v48  ;;  %v2532_v11 = vsub.f32 %v4648_v52, %v2511_v48  ;;  %v2518_v58 = vmax.f32 %v2516_v28, %v2517_v6  ;;  %v1997_v24 = vmul.f32 1.442695, %v4709_v43  ;;  %3272 = vmatmul.mubr.bf16.vlgmr.msra.gmra.mrb[48].mxu0 %v2064_v30 }
 0x33d   : > { %v2042_v52 = vsel %vm1962_vm12, %v4636_v35, %v2026_v18  ;;  %v2024_v47 = vmul.f32 1.6732632, %v2987_v46  ;;  %v2055_v34 = vmul.f32 1.050701, %v2039_v29  ;;  %v2065_v35 = vpack.c.bf16 %v2052_v36, %v2051_v13 }
 0x33e   : > { %v2559_v3 = vmul.f32 1.442695, %v2531_v63  ;;  %v2561_v57 = vmul.f32 1.442695, %v2532_v11  ;;  %v2533_v25 = vsub.f32 %v4657_v59, %v2518_v58  ;;  %v2534_v23 = vsub.f32 %v4659_v56, %v2518_v58 }
 0x33f   : > { %v2058_v28 = vmul.f32 1.050701, %v2042_v52  ;;  %v2040_v59 = vsel %vm1960_vm13, %v4653_v8, %v2024_v47  ;;  %v1940_v56 = vadd.f32 %v4439_v53, %v4563_v39  ;;  %3275 = vmatprep.mubr.bf16.mxu1 %v2065_v35  ;;  %v3577_v16 = vpop.eup %3576  ;;  %vm1963_vm15 = vcmp.gt.f32.partialorder %v4697_v41, 0.0 }
 0x340   : > { %3580 = vpow2.f32 %v2559_v3  ;;  %v2563_v1 = vmul.f32 1.442695, %v2533_v25  ;;  %v2565_v26 = vmul.f32 1.442695, %v2534_v23  ;;  %v2056_v20 = vmul.f32 1.050701, %v2040_v59  ;;  %3276 = vmatmul.mubr.bf16.vlgmr.msra.gmra.mrb[32].mxu1 %v2066_v12 }
 0x341   : > { %3582 = vpow2.f32 %v2561_v57  ;;  %v1993_v9 = vmul.f32 1.442695, %v1940_v56  ;;  %v2068_v6 = vpack.c.bf16 %v2058_v28, %v2057_v17  ;;  %v3579_v53 = vpop.eup %3578  ;;  %v2992_v39 = vadd.f32 -1.0, %v3577_v16 }
 0x342   : > { %3584 = vpow2.f32 %v2563_v1  ;;  %v2067_v48 = vpack.c.bf16 %v2056_v20, %v2055_v34  ;;  %v2990_v4 = vadd.f32 -1.0, %v3579_v53  ;;  %vm1966_vm0 = vcmp.gt.f32.partialorder %v4709_v43, 0.0 }
 0x343   : > { %3586 = vpow2.f32 %v2565_v26  ;;  %v2029_v50 = vmul.f32 1.6732632, %v2992_v39  ;;  %vm1964_vm1 = vcmp.gt.f32.partialorder %v1940_v56, 0.0  ;;  %v2575_v52 = vrot.slane %v4534_v21, 4 }
 0x344   : > { %3588 = vpow2.f32 %v1997_v24  ;;  %3279 = vmatprep.mubr.bf16.mxu1 %v2067_v48  ;;  %v2027_v55 = vmul.f32 1.6732632, %v2990_v4  ;;  %v2589_v47 = vrot.slane %v4596_v42, 4  ;;  %v2596_v0 = vrot.slane %v4640_v51, 4 }
 0x345   : > { %3590 = vpow2.f32 %v1993_v9  ;;  %v2045_v63 = vsel %vm1965_vm14, %v4690_v32, %v2029_v50  ;;  %v2568_v32 = vrot.slane %v4526_v15, 4  ;;  %v2576_v24 = vadd.f32 %v2575_v52, %v4534_v21  ;;  %v4772_v50 = vld [vmem:[%s5007_s14] ss:$0 sm:$0xff] }
 0x346   : > { %v2043_v58 = vsel %vm1963_vm15, %v4697_v41, %v2027_v55  ;;  %v2061_v18 = vmul.f32 1.050701, %v2045_v63  ;;  %v2582_v41 = vrot.slane %v4586_v44, 4  ;;  %v2590_v26 = vadd.f32 %v2589_v47, %v4596_v42 }
 0x347   : > { %v2059_v57 = vmul.f32 1.050701, %v2043_v58  ;;  %v2577_v34 = vrot.slane %v2576_v24, 2  ;;  %v2597_v16 = vadd.f32 %v2596_v0, %v4640_v51  ;;  %vm2719_vm14 = vcmask 1041409  }
 0x348   : > { %3280 = vmatmul.mubr.bf16.gmra.mrb[36].mxu1 %v2068_v6  ;;  %v2583_v1 = vadd.f32 %v2582_v41, %v4586_v44  ;;  %v2603_v44 = vrot.slane %v4676_v19, 4  ;;  %vm2721_vm15 = vcmask 1042434  }
 0x349   : > { %v2578_v35 = vadd.f32 %v2577_v34, %v2576_v24  ;;  %v2598_v42 = vrot.slane %v2597_v16, 2 }
 0x34a   : > { %v4736_v8 = vpop.eup %3580  ;;  %v2584_v59 = vrot.slane %v2583_v1, 2 }
 0x34b   : > { %v4738_v31 = vpop.eup %3582  ;;  %v2599_v51 = vadd.f32 %v2598_v42, %v2597_v16 }
 0x34c   : > { %v4740_v13 = vpop.eup %3584  ;;  %v4744_v2 = vadd.f32 %v4738_v31, %v4736_v8  ;;  %v2585_v9 = vadd.f32 %v2584_v59, %v2583_v1 }
 0x34d   : > { %v4746_v49 = vpop.eup %3586  ;;  %v2600_v41 = vrot.slane %v2599_v51, 1 }
 0x34e   : > { %v3589_v30 = vpop.eup %3588  ;;  %v4750_v7 = vadd.f32 %v4746_v49, %v4740_v13  ;;  %v2586_v53 = vrot.slane %v2585_v9, 1 }
 0x34f   : > { %v3591_v12 = vpop.eup %3590  ;;  %v2993_v36 = vadd.f32 -1.0, %v3589_v30 }
 0x350   : > { %v2991_v40 = vadd.f32 -1.0, %v3591_v12  ;;  %v2587_v30 = vadd.f32 %v2586_v53, %v2585_v9  ;;  %v2604_v12 = vadd.f32 %v2603_v44, %v4676_v19 }
 0x351   : > { %v2030_v11 = vmul.f32 1.6732632, %v2993_v36 }
 0x352   : > { %v2028_v37 = vmul.f32 1.6732632, %v2991_v40 }
 0x353   : > { %v2046_v29 = vsel %vm1966_vm0, %v4709_v43, %v2030_v11  ;;  %v2569_v43 = vadd.f32 %v2568_v32, %v4526_v15  ;;  %v2579_v15 = vrot.slane %v2578_v35, 1  ;;  %vm2723_vm0 = vcmask 1043459  }
 0x354   : > { %v2062_v46 = vmul.f32 1.050701, %v2046_v29  ;;  %v2044_v3 = vsel %vm1964_vm1, %v1940_v56, %v2028_v37  ;;  %v2591_v56 = vrot.slane %v2590_v26, 2 }
 0x355   : > { %v2060_v25 = vmul.f32 1.050701, %v2044_v3  ;;  %v2570_v28 = vrot.slane %v2569_v43, 2  ;;  %v2580_v4 = vadd.f32 %v2579_v15, %v2578_v35 }
 0x356   : > { %v2070_v23 = vpack.c.bf16 %v2062_v46, %v2061_v18  ;;  %v2592_v48 = vadd.f32 %v2591_v56, %v2590_v26  ;;  %v2601_v56 = vadd.f32 %v2600_v41, %v2599_v51 }
 0x357   : > { %v2069_v17 = vpack.c.bf16 %v2060_v25, %v2059_v57  ;;  %v2571_v20 = vadd.f32 %v2570_v28, %v2569_v43 }
 0x358   : > { %v2593_v21 = vrot.slane %v2592_v48, 1 }
 0x359   : > { %3283 = vmatprep.mubr.bf16.mxu1 %v2069_v17  ;;  %v2572_v6 = vrot.slane %v2571_v20, 1  ;;  %v2605_v17 = vrot.slane %v2604_v12, 2 }
 0x35a   : > { %3284 = vmatmul.mubr.bf16.gmra.mrb[40].mxu1 %v2070_v23  ;;  %v2594_v55 = vadd.f32 %v2593_v21, %v2592_v48 }
 0x35b   : > { %v2573_v39 = vadd.f32 %v2572_v6, %v2571_v20  ;;  %v2606_v34 = vadd.f32 %v2605_v17, %v2604_v12 }
 0x35d   : > { %3592 = vrcp.f32 %v2573_v39  ;;  %v2607_v44 = vrot.slane %v2606_v34, 1 }
 0x35e   : > { %3594 = vrcp.f32 %v2580_v4 }
 0x35f   : > { %3596 = vrcp.f32 %v2587_v30 }
 0x360   : > { %3598 = vrcp.f32 %v2594_v55 }
 0x367   : > { %v4813_v16 = vpop.eup %3592 }
 0x368   : > { %v4818_v21 = vpop.eup %3594 }
 0x369   : > { %v4821_v42 = vpop.eup %3596 }
 0x36a   : > { %v4828_v12 = vpop.eup %3598 }
 0x40f   : > { %v3273_v36 = vpop.f32.mrb[48].mxu0 }
 0x410   : > { %v4776_v63 = vadd.f32 %v3273_v36, %v4772_v50  ;;  %v2176_v11 = vpop.f32.mrb[49].mxu0 }
 0x411   : > { %v4782_v29 = vadd.f32 %v4772_v50, %v2176_v11  ;;  %v3274_v18 = vpop.f32.mrb[50].mxu0  ;;  %v4831_v11 = vadd.f32 %v2607_v44, %v2606_v34 }
 0x412   : > { %v2259_v3 = vmul.f32 1.442695, %v4776_v63  ;;  %v4789_v57 = vadd.f32 %v3274_v18, %v4772_v50  ;;  %v2179_v25 = vpop.f32.mrb[51].mxu0  ;;  %vm2241_vm2 = vcmp.gt.f32.partialorder %v4776_v63, 0.0 }
 0x413   : > { %v3277_v40 = vpop.f32.mrb[32].mxu1  ;;  %v2255_v32 = vmul.f32 1.442695, %v4782_v29  ;;  %v4793_v52 = vadd.f32 %v4772_v50, %v2179_v25  ;;  %vm2239_vm3 = vcmp.gt.f32.partialorder %v4782_v29, 0.0 }
 0x414   : > { %v4779_v58 = vadd.f32 %v3277_v40, %v4772_v50  ;;  %v2192_v37 = vpop.f32.mrb[33].mxu1  ;;  %3600 = vpow2.f32 %v2259_v3  ;;  %v2261_v47 = vmul.f32 1.442695, %v4789_v57  ;;  %vm2242_vm4 = vcmp.gt.f32.partialorder %v4789_v57, 0.0 }
 0x415   : > { %v4785_v46 = vadd.f32 %v4772_v50, %v2192_v37  ;;  %v3278_v19 = vpop.f32.mrb[34].mxu1  ;;  %3602 = vpow2.f32 %v2255_v32  ;;  %v2257_v24 = vmul.f32 1.442695, %v4793_v52  ;;  %vm2240_vm6 = vcmp.gt.f32.partialorder %v4793_v52, 0.0 }
 0x416   : > { %v2195_v23 = vpop.f32.mrb[35].mxu1  ;;  %v2267_v43 = vmul.f32 1.442695, %v4779_v58  ;;  %3604 = vpow2.f32 %v2261_v47  ;;  %v4800_v26 = vadd.f32 %v3278_v19, %v4772_v50  ;;  %vm2245_vm5 = vcmp.gt.f32.partialorder %v4779_v58, 0.0 }
 0x417   : > { %v2263_v1 = vmul.f32 1.442695, %v4785_v46  ;;  %v4803_v28 = vadd.f32 %v4772_v50, %v2195_v23  ;;  %3606 = vpow2.f32 %v2257_v24  ;;  %vm2243_vm7 = vcmp.gt.f32.partialorder %v4785_v46, 0.0 }
 0x418   : > { %3608 = vpow2.f32 %v2267_v43  ;;  %v2269_v20 = vmul.f32 1.442695, %v4800_v26  ;;  %vm2246_vm8 = vcmp.gt.f32.partialorder %v4800_v26, 0.0 }
 0x419   : > { %3610 = vpow2.f32 %v2263_v1  ;;  %v2265_v35 = vmul.f32 1.442695, %v4803_v28  ;;  %vm2244_vm9 = vcmp.gt.f32.partialorder %v4803_v28, 0.0 }
 0x41a   : > { %3612 = vpow2.f32 %v2269_v20 }
 0x41b   : > { %v3281_v59 = vpop.f32.mrb[36].mxu1  ;;  %3614 = vpow2.f32 %v2265_v35 }
 0x41c   : > { %v2208_v0 = vpop.f32.mrb[37].mxu1  ;;  %v4808_v9 = vadd.f32 %v3281_v59, %v4772_v50  ;;  %3616 = vrcp.f32 %v2601_v56 }
 0x41d   : > { %v4811_v48 = vadd.f32 %v4772_v50, %v2208_v0  ;;  %v3282_v6 = vpop.f32.mrb[38].mxu1 }
 0x41e   : > { %v4816_v15 = vadd.f32 %v3282_v6, %v4772_v50  ;;  %v2211_v53 = vpop.f32.mrb[39].mxu1  ;;  %v2275_v39 = vmul.f32 1.442695, %v4808_v9  ;;  %v3601_v36 = vpop.eup %3600  ;;  %vm2249_vm10 = vcmp.gt.f32.partialorder %v4808_v9, 0.0 }
 0x41f   : > { %v2271_v4 = vmul.f32 1.442695, %v4811_v48  ;;  %v4826_v55 = vadd.f32 %v4772_v50, %v2211_v53  ;;  %v3603_v51 = vpop.eup %3602  ;;  %v3005_v37 = vadd.f32 -1.0, %v3601_v36  ;;  %vm2247_vm11 = vcmp.gt.f32.partialorder %v4811_v48, 0.0 }
 0x420   : > { %v2277_v30 = vmul.f32 1.442695, %v4816_v15  ;;  %3618 = vpow2.f32 %v2275_v39  ;;  %v3605_v18 = vpop.eup %3604  ;;  %v3003_v19 = vadd.f32 -1.0, %v3603_v51  ;;  %vm2250_vm12 = vcmp.gt.f32.partialorder %v4816_v15, 0.0 }
 0x421   : > { %3620 = vpow2.f32 %v2271_v4  ;;  %v2273_v40 = vmul.f32 1.442695, %v4826_v55  ;;  %v3607_v3 = vpop.eup %3606  ;;  %v2305_v25 = vmul.f32 1.6732632, %v3005_v37  ;;  %v3006_v23 = vadd.f32 -1.0, %v3605_v18 }
 0x422   : > { %3622 = vpow2.f32 %v2277_v30  ;;  %v3609_v17 = vpop.eup %3608  ;;  %v2303_v32 = vmul.f32 1.6732632, %v3003_v19  ;;  %v3004_v41 = vadd.f32 -1.0, %v3607_v3  ;;  %vm2248_vm13 = vcmp.gt.f32.partialorder %v4826_v55, 0.0 }
 0x423   : > { %3624 = vpow2.f32 %v2273_v40  ;;  %v3611_v47 = vpop.eup %3610  ;;  %v2321_v43 = vsel %vm2241_vm2, %v4776_v63, %v2305_v25  ;;  %v2306_v24 = vmul.f32 1.6732632, %v3006_v23  ;;  %v3009_v1 = vadd.f32 -1.0, %v3609_v17 }
 0x424   : > { %v3613_v34 = vpop.eup %3612  ;;  %v2337_v59 = vmul.f32 1.050701, %v2321_v43  ;;  %v2319_v56 = vsel %vm2239_vm3, %v4782_v29, %v2303_v32  ;;  %v2304_v20 = vmul.f32 1.6732632, %v3004_v41  ;;  %v3007_v0 = vadd.f32 -1.0, %v3611_v47 }
 0x425   : > { %v3615_v6 = vpop.eup %3614  ;;  %v2335_v53 = vmul.f32 1.050701, %v2319_v56  ;;  %v2322_v63 = vsel %vm2242_vm4, %v4789_v57, %v2306_v24  ;;  %v2309_v44 = vmul.f32 1.6732632, %v3009_v1  ;;  %v3010_v39 = vadd.f32 -1.0, %v3613_v34 }
 0x426   : > { %v4855_v30 = vpop.eup %3616  ;;  %v2625_v29 = vmul.f32 %v4503_v62, %v2337_v59  ;;  %v2338_v36 = vmul.f32 1.050701, %v2322_v63  ;;  %v2320_v40 = vsel %vm2240_vm6, %v4793_v52, %v2304_v20  ;;  %v2307_v51 = vmul.f32 1.6732632, %v3007_v0 }
 0x427   : > { %v2623_v57 = vmul.f32 %v4511_v33, %v2335_v53  ;;  %v2336_v19 = vmul.f32 1.050701, %v2320_v40  ;;  %v2325_v3 = vsel %vm2245_vm5, %v4779_v58, %v2309_v44  ;;  %v2310_v25 = vmul.f32 1.6732632, %v3010_v39 }
 0x428   : > { %v2626_v17 = vmul.f32 %v4522_v14, %v2338_v36  ;;  %v2341_v52 = vmul.f32 1.050701, %v2325_v3  ;;  %v2323_v32 = vsel %vm2243_vm7, %v4785_v46, %v2307_v51  ;;  %v3008_v41 = vadd.f32 -1.0, %v3615_v6 }
 0x429   : > { %v2624_v47 = vmul.f32 %v4519_v45, %v2336_v19  ;;  %v2339_v43 = vmul.f32 1.050701, %v2323_v32  ;;  %v2326_v58 = vsel %vm2246_vm8, %v4800_v26, %v2310_v25  ;;  %vm2725_vm2 = vcmask 1044484  }
 0x42a   : > { %v3619_v18 = vpop.eup %3618  ;;  %v2646_v1 = vadd.f32 %v2626_v17, %v2625_v29  ;;  %v2629_v14 = vmul.f32 %v4588_v54, %v2341_v52  ;;  %v2342_v34 = vmul.f32 1.050701, %v2326_v58  ;;  %v2308_v59 = vmul.f32 1.6732632, %v3008_v41 }
 0x42b   : > { %v3621_v23 = vpop.eup %3620  ;;  %v3013_v24 = vadd.f32 -1.0, %v3619_v18  ;;  %v2639_v46 = vadd.f32 %v2624_v47, %v2623_v57  ;;  %v2627_v56 = vmul.f32 %v4569_v10, %v2339_v43  ;;  %vm2727_vm3 = vcmask 1045509  }
 0x42c   : > { %v3623_v33 = vpop.eup %3622  ;;  %v3011_v0 = vadd.f32 -1.0, %v3621_v23  ;;  %v2647_v45 = vrot.slane %v2646_v1, 4  ;;  %v2630_v53 = vmul.f32 %v4592_v60, %v2342_v34  ;;  %v2324_v26 = vsel %vm2244_vm9, %v4803_v28, %v2308_v59 }
 0x42d   : > { %v4848_v35 = vpop.f32.mrb[40].mxu1  ;;  %v2313_v20 = vmul.f32 1.6732632, %v3013_v24  ;;  %v3625_v6 = vpop.eup %3624  ;;  %v3014_v63 = vadd.f32 -1.0, %v3623_v33  ;;  %v2640_v44 = vrot.slane %v2639_v46, 4  ;;  %vm2729_vm7 = vcmask 1046534  }
 0x42e   : > { %v4853_v4 = vpop.f32.mrb[41].mxu1  ;;  %v2340_v54 = vmul.f32 1.050701, %v2324_v26  ;;  %v2311_v29 = vmul.f32 1.6732632, %v3011_v0  ;;  %v2648_v36 = vadd.f32 %v2647_v45, %v2646_v1  ;;  %v2660_v10 = vadd.f32 %v2630_v53, %v2629_v14 }
 0x42f   : > { %v4862_v37 = vpop.f32.mrb[42].mxu1  ;;  %v2329_v39 = vsel %vm2249_vm10, %v4808_v9, %v2313_v20  ;;  %v2314_v51 = vmul.f32 1.6732632, %v3014_v63  ;;  %v2641_v18 = vadd.f32 %v2640_v44, %v2639_v46  ;;  %v3012_v28 = vadd.f32 -1.0, %v3625_v6 }
 0x430   : > { %v4868_v62 = vpop.f32.mrb[43].mxu1  ;;  %v2345_v40 = vmul.f32 1.050701, %v2329_v39  ;;  %v2628_v57 = vmul.f32 %v4575_v38, %v2340_v54  ;;  %v2327_v60 = vsel %vm2247_vm11, %v4811_v48, %v2311_v29  ;;  %v2649_v19 = vrot.slane %v2648_v36, 2 }
 0x431   : > { %v2661_v3 = vrot.slane %v2660_v10, 4  ;;  %v2343_v23 = vmul.f32 1.050701, %v2327_v60  ;;  %v2642_v17 = vrot.slane %v2641_v18, 2  ;;  %v2330_v52 = vsel %vm2250_vm12, %v4816_v15, %v2314_v51 }
 0x432   : > { %v2633_v25 = vmul.f32 %v4661_v61, %v2345_v40  ;;  %v2653_v9 = vadd.f32 %v2628_v57, %v2627_v56  ;;  %v2312_v32 = vmul.f32 1.6732632, %v3012_v28  ;;  %v2650_v41 = vadd.f32 %v2649_v19, %v2648_v36 }
 0x433   : > { %v2662_v33 = vadd.f32 %v2661_v3, %v2660_v10  ;;  %v2631_v38 = vmul.f32 %v4622_v27, %v2343_v23  ;;  %v2346_v47 = vmul.f32 1.050701, %v2330_v52  ;;  %v2643_v43 = vadd.f32 %v2642_v17, %v2641_v18 }
 0x434   : > { %v2654_v48 = vrot.slane %v2653_v9, 4  ;;  %v2328_v58 = vsel %vm2248_vm13, %v4826_v55, %v2312_v32  ;;  %v4903_v61 = vadd.f32 %v4848_v35, %v4772_v50  ;;  %v2651_v24 = vrot.slane %v2650_v41, 1 }
 0x435   : > { %v2663_v1 = vrot.slane %v2662_v33, 2  ;;  %v2634_v15 = vmul.f32 %v4670_v22, %v2346_v47  ;;  %v2344_v14 = vmul.f32 1.050701, %v2328_v58  ;;  %v2644_v34 = vrot.slane %v2643_v43, 1 }
 0x436   : > { %v2655_v59 = vadd.f32 %v2654_v48, %v2653_v9  ;;  %v2283_v27 = vmul.f32 1.442695, %v4903_v61  ;;  %v2652_v46 = vadd.f32 %v2651_v24, %v2650_v41  ;;  %v4910_v35 = vadd.f32 %v4772_v50, %v4853_v4 }
 0x437   : > { %v2664_v56 = vadd.f32 %v2663_v1, %v2662_v33  ;;  %v2674_v20 = vadd.f32 %v2634_v15, %v2633_v25  ;;  %v2632_v0 = vmul.f32 %v4629_v5, %v2344_v14  ;;  %v2645_v55 = vadd.f32 %v2644_v34, %v2643_v43 }
 0x438   : > { %v2656_v6 = vrot.slane %v2655_v59, 2  ;;  %3626 = vpow2.f32 %v2283_v27  ;;  %v2704_v22 = vmul.f32 %v4818_v21, %v2652_v46  ;;  %v2279_v54 = vmul.f32 1.442695, %v4910_v35 }
 0x439   : > { %v2665_v45 = vrot.slane %v2664_v56, 1  ;;  %v2675_v53 = vrot.slane %v2674_v20, 4  ;;  %v2667_v26 = vadd.f32 %v2632_v0, %v2631_v38  ;;  %3628 = vrcp.f32 %v4831_v11 }
 0x43a   : > { %v2703_v63 = vmul.f32 %v4813_v16, %v2645_v55  ;;  %v2657_v44 = vadd.f32 %v2656_v6, %v2655_v59  ;;  %v4918_v36 = vadd.f32 %v4862_v37, %v4772_v50  ;;  %3630 = vpow2.f32 %v2279_v54 }
 0x43b   : > { %v2666_v5 = vadd.f32 %v2665_v45, %v2664_v56  ;;  %v2676_v39 = vadd.f32 %v2675_v53, %v2674_v20  ;;  %v2668_v29 = vrot.slane %v2667_v26, 4  ;;  %v4922_v21 = vadd.f32 %v4772_v50, %v4868_v62 }
 0x43c   : > { %v2658_v4 = vrot.slane %v2657_v44, 1  ;;  %v2720_v11 = vsel %vm2719_vm14, %v2704_v22, %v2703_v63  ;;  %v2617_v51 = vrot.slane %v4750_v7, 4  ;;  %v2285_v57 = vmul.f32 1.442695, %v4918_v36 }
 0x43d   : > { %v2706_v16 = vmul.f32 %v4828_v12, %v2666_v5  ;;  %v2677_v10 = vrot.slane %v2676_v39, 2  ;;  %v2669_v40 = vadd.f32 %v2668_v29, %v2667_v26  ;;  %v2281_v37 = vmul.f32 1.442695, %v4922_v21 }
 0x43e   : > { %v2659_v18 = vadd.f32 %v2658_v4, %v2657_v44  ;;  %v2610_v19 = vrot.slane %v4744_v2, 4  ;;  %3632 = vpow2.f32 %v2285_v57  ;;  %v2618_v25 = vadd.f32 %v2617_v51, %v4750_v7 }
 0x43f   : > { %v2678_v60 = vadd.f32 %v2677_v10, %v2676_v39  ;;  %v2670_v28 = vrot.slane %v2669_v40, 2  ;;  %3634 = vpow2.f32 %v2281_v37  ;;  %vm2253_vm1 = vcmp.gt.f32.partialorder %v4903_v61, 0.0 }
 0x440   : > { %v2705_v50 = vmul.f32 %v4821_v42, %v2659_v18  ;;  %v2611_v33 = vadd.f32 %v2610_v19, %v4744_v2  ;;  %v2619_v48 = vrot.slane %v2618_v25, 2  ;;  %vm2251_vm4 = vcmp.gt.f32.partialorder %v4910_v35, 0.0 }
 0x441   : > { %v2679_v62 = vrot.slane %v2678_v60, 1  ;;  %v2671_v12 = vadd.f32 %v2670_v28, %v2669_v40  ;;  %vm2254_vm5 = vcmp.gt.f32.partialorder %v4918_v36, 0.0  ;;  %vm2252_vm6 = vcmp.gt.f32.partialorder %v4922_v21, 0.0 }
 0x442   : > { %v3627_v3 = vpop.eup %3626  ;;  %v2722_v23 = vsel %vm2721_vm15, %v2705_v50, %v2720_v11  ;;  %v2612_v1 = vrot.slane %v2611_v33, 2  ;;  %v2620_v56 = vadd.f32 %v2619_v48, %v2618_v25  ;;  %vm2731_vm8 = vcmask 1047559  }
 0x443   : > { %v2680_v17 = vadd.f32 %v2679_v62, %v2678_v60  ;;  %v2672_v9 = vrot.slane %v2671_v12, 1  ;;  %v3017_v52 = vadd.f32 -1.0, %v3627_v3  ;;  %v2724_v32 = vsel %vm2723_vm0, %v2706_v16, %v2722_v23  ;;  %v3629_v41 = vpop.eup %3628 }
 0x444   : > { %v3631_v42 = vpop.eup %3630  ;;  %v2621_v53 = vrot.slane %v2620_v56, 1 }
 0x445   : > { %v2673_v38 = vadd.f32 %v2672_v9, %v2671_v12  ;;  %v2317_v47 = vmul.f32 1.6732632, %v3017_v52  ;;  %v2708_v43 = vmul.f32 %v3629_v41, %v2680_v17  ;;  %v3015_v24 = vadd.f32 -1.0, %v3631_v42 }
 0x446   : > { %v2622_v39 = vadd.f32 %v2621_v53, %v2620_v56 }
 0x447   : > { %v2333_v58 = vsel %vm2253_vm1, %v4903_v61, %v2317_v47  ;;  %v2707_v7 = vmul.f32 %v4855_v30, %v2673_v38  ;;  %v2315_v14 = vmul.f32 1.6732632, %v3015_v24  ;;  %v2613_v61 = vadd.f32 %v2612_v1, %v2611_v33 }
 0x448   : > { %v2349_v15 = vmul.f32 1.050701, %v2333_v58  ;;  %v3633_v59 = vpop.eup %3632  ;;  %3636 = vrcp.f32 %v2622_v39 }
 0x449   : > { %v2726_v34 = vsel %vm2725_vm2, %v2707_v7, %v2724_v32  ;;  %v3635_v46 = vpop.eup %3634  ;;  %v2331_v20 = vsel %vm2251_vm4, %v4910_v35, %v2315_v14  ;;  %v3018_v0 = vadd.f32 -1.0, %v3633_v59  ;;  %v2614_v26 = vrot.slane %v2613_v61, 1 }
 0x44a   : > { %v2637_v2 = vmul.f32 %v4740_v13, %v2349_v15  ;;  %v2728_v27 = vsel %vm2727_vm3, %v2708_v43, %v2726_v34  ;;  %v2347_v55 = vmul.f32 1.050701, %v2331_v20  ;;  %v3016_v6 = vadd.f32 -1.0, %v3635_v46 }
 0x44b   : > { %v2318_v30 = vmul.f32 1.6732632, %v3018_v0 }
 0x44c   : > { %v2635_v22 = vmul.f32 %v4736_v8, %v2347_v55  ;;  %v2316_v45 = vmul.f32 1.6732632, %v3016_v6  ;;  %v2615_v8 = vadd.f32 %v2614_v26, %v2613_v61 }
 0x44d   : > { %v2334_v13 = vsel %vm2254_vm5, %v4918_v36, %v2318_v30 }
 0x44e   : > { %v2350_v63 = vmul.f32 1.050701, %v2334_v13  ;;  %v2332_v35 = vsel %vm2252_vm6, %v4922_v21, %v2316_v45  ;;  %3638 = vrcp.f32 %v2615_v8 }
 0x44f   : > { %v2348_v44 = vmul.f32 1.050701, %v2332_v35 }
 0x450   : > { %v2638_v54 = vmul.f32 %v4746_v49, %v2350_v63 }
 0x451   : > { %v2636_v5 = vmul.f32 %v4738_v31, %v2348_v44 }
 0x452   : > { %v2688_v29 = vadd.f32 %v2638_v54, %v2637_v2  ;;  %v3637_v37 = vpop.eup %3636 }
 0x453   : > { %v2681_v4 = vadd.f32 %v2636_v5, %v2635_v22 }
 0x454   : > { %v2689_v11 = vrot.slane %v2688_v29, 4 }
 0x455   : > { %v2682_v16 = vrot.slane %v2681_v4, 4 }
 0x456   : > { %v2690_v36 = vadd.f32 %v2689_v11, %v2688_v29 }
 0x457   : > { %v2683_v10 = vadd.f32 %v2682_v16, %v2681_v4 }
 0x458   : > { %v2691_v40 = vrot.slane %v2690_v36, 2  ;;  %v3639_v28 = vpop.eup %3638 }
 0x459   : > { %v2684_v51 = vrot.slane %v2683_v10, 2 }
 0x45a   : > { %v2692_v21 = vadd.f32 %v2691_v40, %v2690_v36 }
 0x45b   : > { %v2685_v18 = vadd.f32 %v2684_v51, %v2683_v10 }
 0x45c   : > { %v2693_v49 = vrot.slane %v2692_v21, 1 }
 0x45d   : > { %v2686_v57 = vrot.slane %v2685_v18, 1 }
 0x45e   : > { %v2694_v31 = vadd.f32 %v2693_v49, %v2692_v21 }
 0x45f   : > { %v2687_v60 = vadd.f32 %v2686_v57, %v2685_v18 }
 0x460   : > { %v2710_v19 = vmul.f32 %v3637_v37, %v2694_v31 }
 0x461   : > { %v2709_v50 = vmul.f32 %v3639_v28, %v2687_v60 }
 0x463   : > { %v2730_v62 = vsel %vm2729_vm7, %v2709_v50, %v2728_v27 }
 0x464   : > { %v2732_v12 = vsel %vm2731_vm8, %v2710_v19, %v2730_v62 }
 0x465   : > { %2734 = vst [vmem:[%s526_s20] sm:$0xff] %v2732_v12 }
 0x466   : > { %3653 = shalt.err (!%p3650_p3)
}
 0x467   : > { %s3654_s17 = scalar_lea.hbm %s4951_s25, 128  ;;  %s3658_s30 = scalar_lea.hbm %s5008_s15, 512 }
 0x468   : > { %p3655_p4 = scmp.ne.s32.totalorder %s4951_s25, %s3654_s17  ;;  %p3659_p9 = scmp.lt.u32.totalorder %s4951_s25, %s5008_s15 }
 0x469   : > { %p3660_p10 = scmp.lt.u32.totalorder %s3658_s30, %s3654_s17  ;;  %p3662_p12 = scmp.lt.u32.totalorder %s3654_s17, %s4951_s25 }
 0x46a   : > { %p3656_p7 = pnand %p3655_p4, %p3824_p5 }
 0x46b   : > { %p3661_p11 = por %p3660_p10, %p3659_p9 }
 0x46c   : > { %p3657_p8 = pneg %p3656_p7 }
 0x46d   : > { %p3663_p13 = por %p3662_p12, %p3661_p11 }
 0x46f   : > { %p3664_p0 = pnand %p3663_p13, %p3657_p8 }
 0x471   : > { %3667 = shalt.err (!%p3664_p0)
}
 0x472   : > { %3303 = dma.vmem_to_hbm [thread:$0]  (%p3824_p5), %s4953_s24, 128, %s4951_s25, %s2736_s23  }
 0x473 PF: > { %p3309_p1 = scmp.ge.s32.totalorder %s3702_s21, 2  ;;  %s2761_s1 = sand.u32 1, %s3690_s18  }
 0x474   : > { %s2762_s16 = scalar_lea.sflag [#allocation3], %s2761_s1 }
 0x475   : > { %p3306_p2 = pnand %p3309_p1, %p3828_p6 }
 0x477   : > { %3685 = dma.done.wait (!%p3306_p2), %s2762_s16, 128  }
 0x478   : > { %3687 = vsyncadd (!%p3306_p2), %s2762_s16, 4294967168  ;;  %s5021_s21 = sld [smem:[#allocation6_spill]]  ;;  %s5022_s27 = sld [smem:[#allocation5_spill]] }
 0x479   : > { %s5023_s20 = sld [smem:[#allocation7_spill]]  ;;  %s5024_s18 = smov %s3694_s19 }
 0x47e   : > { %p25_p3 = scmp.ge.s32.totalorder %s5021_s21, 6   ;;  %s5025_s19 = smov %s5022_s27 }
 0x480   :  { %27 = sbr.rel (!%p25_p3) target bundleno = 6 (0x6), region = 121 }
 0x487   :  { %2767 = vsyncpa [#allocation3], 1 }
 0x488   :  { %2769 = vsyncpa [#allocation3 + $0x1], 1 }

</bundles_post_ra>
